<compile_context>
chip_gen: v6e
topology: v6e:2x2x1
jax: 0.10.0
libtpu: 0.0.40
codegen_flags: <defaults>
</compile_context>

<pallas_src>
import functools
import math

import jax
import jax.numpy as jnp
import numpy as np
from jax import lax
from jax.experimental import pallas as pl
from jax.experimental.pallas import tpu as pltpu

EPS = 1e-5          # nn.InstanceNorm2d default eps
NEG_SLOPE = 0.2     # LeakyReLU negative_slope


# ---------------------------------------------------------------------------
# Hardware-aware sizing helpers
# ---------------------------------------------------------------------------
def _tpu_vmem_capacity():
    """Physical VMEM per TensorCore (128 MiB on v5e/v6e, 64 MiB on v7x)."""
    try:
        info = pltpu.get_tpu_info()
        for attr in ("vmem_capacity_bytes", "vmem_bytes", "vmem_size_bytes"):
            v = getattr(info, attr, None)
            if v:
                return int(v)
    except Exception:
        pass
    try:
        kind = getattr(jax.devices()[0], "device_kind", "").lower()
        if "v7" in kind:
            return 64 << 20
    except Exception:
        pass
    return 128 << 20


def _default_bf16_mxu():
    """bf16 MXU inputs by default on v6e/v7x (fast bf16 MXU generations)."""
    try:
        kind = getattr(jax.devices()[0], "device_kind", "").lower()
        return any(t in kind for t in ("v6", "v7", "trillium"))
    except Exception:
        return False


def _padded_width(W, C):
    """Smallest padded row width wp >= W+2 with (wp*C) % 128 == 0 (lane-dense
    unmasked stores), unless that inflates the row by more than ~1.5x."""
    base = W + 2
    step = 128 // math.gcd(128, C)
    wp = ((base + step - 1) // step) * step
    if wp * C <= max(int(1.5 * base * C), base * C + 256):
        return wp
    return base


def _working_set_bytes(tile_h, W, Cin, Cout, wp_in, wp_out, in_bytes=4):
    """Approximate per-step VMEM footprint (inputs+outputs double-buffered)."""
    def lane_pad(n):
        return ((n + 127) // 128) * 128
    io_in = in_bytes * (tile_h + 16) * wp_in * Cin          # body + 2 halo blocks
    io_out = 4 * tile_h * wp_out * Cout                     # conv-out rows
    interm = (4 * (tile_h + 2) * lane_pad(wp_in * Cin)      # window
              + in_bytes * tile_h * W * lane_pad(9 * Cin)   # im2col patch
              + 4 * tile_h * W * lane_pad(Cout))            # f32 accumulator
    return 2 * (io_in + io_out) + interm


def _pick_tile_h(H, W, C, wp_in, wp_out, n_images, budget_bytes):
    """Largest tile_h (multiple of 8 dividing H) whose working set fits."""
    best = 8
    for t in range(8, H + 1, 8):
        if H % t:
            continue
        if _working_set_bytes(t, W, C, C, wp_in, wp_out) <= budget_bytes:
            best = t
    # v7x has 2 TensorCores: avoid a single, unbalanced grid point when N == 1.
    if n_images == 1 and best == H and H >= 16 and (H // 2) % 8 == 0:
        best = H // 2
    return best


def _vmem_limit_bytes(need_bytes, capacity_bytes):
    cap = (capacity_bytes * 3) // 4    # headroom: ~48 MiB on v7x, ~96 MiB on v5e/v6e
    return int(min(cap, max(2 * need_bytes, 16 << 20)))


# ---------------------------------------------------------------------------
# Kernel
# ---------------------------------------------------------------------------
def _conv_tile_kernel(*refs, W, Cin, Cout, tile_h, wp_in, wp_out,
                      fuse_prenorm, use_bf16):
    """3x3 conv over one row tile (+ optional fused pre-norm/LeakyReLU).

    refs (fuse_prenorm=True):
      top, body, bot, weight, mean, rstd, y, stats
    refs (fuse_prenorm=False):
      top, body, bot, weight, y, stats

    top:   (1, 8, wp_in*Cin)       8-row block whose LAST row is the top halo
    body:  (1, tile_h, wp_in*Cin)  the tile's own rows
    bot:   (1, 8, wp_in*Cin)       8-row block whose FIRST row is the bottom halo
    weight:(9*Cin, Cout)           conv weight, (dy, dx, cin) flattened, MXU dtype
    mean:  (1, 1, wp_in*Cin)       per-channel mean (zeroed on conv-pad columns)
    rstd:  (1, 1, wp_in*Cin)       per-channel rstd (zeroed on conv-pad columns)
    y:     (1, tile_h, wp_out*Cout) lane-dense, W-padded conv-output rows
    stats: (1, 1, 1, 2*Cout)       per-tile (sum | sumsq), lane-concatenated
    """
    if fuse_prenorm:
        (top_ref, body_ref, bot_ref, w_ref, mean_ref, rstd_ref,
         y_ref, stats_ref) = refs
    else:
        top_ref, body_ref, bot_ref, w_ref, y_ref, stats_ref = refs
        mean_ref = rstd_ref = None

    i = pl.program_id(1)
    n_tiles = pl.num_programs(1)

    top = top_ref[0, 7:8, :]          # (1, wp_in*Cin)
    body = body_ref[0]                # (tile_h, wp_in*Cin)
    bot = bot_ref[0, 0:1, :]          # (1, wp_in*Cin)

    if fuse_prenorm:
        # Previous layer's InstanceNorm + LeakyReLU fused into this input path.
        # mean/rstd are pre-zeroed on the conv-padding columns, so padded zeros
        # stay zero after normalization -- no lane mask needed.
        m = mean_ref[0]
        r = rstd_ref[0]

        def _pn(v):
            v = (v.astype(jnp.float32) - m) * r
            return jnp.where(v >= 0, v, NEG_SLOPE * v)

        top, body, bot = _pn(top), _pn(body), _pn(bot)

    # Out-of-image halo rows are SAME-conv zeros: mask only the two 1-row
    # slices (the old full-window broadcasted-iota mask is gone).
    top = jnp.where(i > 0, top, jnp.zeros_like(top))
    bot = jnp.where(i < n_tiles - 1, bot, jnp.zeros_like(bot))

    win = jnp.concatenate([top, body, bot], axis=0)   # (tile_h+2, wp_in*Cin)
    if use_bf16 and win.dtype != jnp.bfloat16:
        win = win.astype(jnp.bfloat16)                # one window-sized cast

    # im2col: one (tile_h*W, 9*Cin) patch -> single MXU matmul with K = 9*Cin.
    # TODO(synk): for small Cout (<128/256) the matmul N-dim underfills the MXU
    # lanes; a transposed (Cout,9Cin)@(9Cin,tile_h*W) formulation (or per-dy
    # MRB accumulation on v7x) would raise MXU utilization further.
    x3 = win.reshape(tile_h + 2, wp_in, Cin)
    taps = [x3[dy:dy + tile_h, dx:dx + W, :]
            for dy in range(3) for dx in range(3)]
    patch = jnp.concatenate(taps, axis=2).reshape(tile_h * W, 9 * Cin)

    acc = jnp.dot(patch, w_ref[...], preferred_element_type=jnp.float32)

    # Per-tile InstanceNorm partials, lane-concatenated -> one 2*Cout-wide store.
    s = jnp.sum(acc, axis=0, keepdims=True)              # (1, Cout)
    ss = jnp.sum(acc * acc, axis=0, keepdims=True)       # (1, Cout)
    stats_ref[...] = jnp.concatenate([s, ss], axis=1).reshape(1, 1, 1, 2 * Cout)

    # Lane-dense, W-padded output rows (directly the next layer's input layout).
    yt = acc.reshape(tile_h, W, Cout)
    zl = jnp.zeros((tile_h, 1, Cout), acc.dtype)
    zr = jnp.zeros((tile_h, wp_out - W - 1, Cout), acc.dtype)
    yt = jnp.concatenate([zl, yt, zr], axis=1).reshape(1, tile_h, wp_out * Cout)
    y_ref[...] = yt.astype(y_ref.dtype)


def _conv_pass(x_rows, w_flat, mean_t, rstd_t, *, W, Cin, Cout, tile_h,
               wp_in, wp_out, fuse_prenorm, use_bf16, out_dtype, vmem_limit):
    """One row-tiled conv pass.  x_rows: (N, H, wp_in*Cin) lane-dense rows."""
    N, H, lanes_in = x_rows.shape
    assert lanes_in == wp_in * Cin
    assert H % 8 == 0 and tile_h % 8 == 0 and H % tile_h == 0
    T = H // tile_h
    RB = tile_h // 8                     # 8-row blocks per tile
    lanes_out = wp_out * Cout

    kern = functools.partial(
        _conv_tile_kernel, W=W, Cin=Cin, Cout=Cout, tile_h=tile_h,
        wp_in=wp_in, wp_out=wp_out, fuse_prenorm=fuse_prenorm,
        use_bf16=use_bf16)

    in_specs = [
        # 8-row block whose LAST row is the top halo (clamped at i == 0;
        # the stale row is masked to zero in-kernel).
        pl.BlockSpec((1, 8, lanes_in),
                     lambda n, i: (n, jnp.maximum(i * RB - 1, 0), 0)),
        # the tile's own rows
        pl.BlockSpec((1, tile_h, lanes_in), lambda n, i: (n, i, 0)),
        # 8-row block whose FIRST row is the bottom halo (clamped at the last
        # tile; masked to zero in-kernel).
        pl.BlockSpec((1, 8, lanes_in),
                     lambda n, i: (n, jnp.minimum((i + 1) * RB, H // 8 - 1), 0)),
        # weight stays resident across the whole grid, already in MXU dtype.
        pl.BlockSpec((9 * Cin, Cout), lambda n, i: (0, 0)),
    ]
    args = [x_rows, x_rows, x_rows, w_flat]
    if fuse_prenorm:
        in_specs += [pl.BlockSpec((1, 1, lanes_in), lambda n, i: (n, 0, 0)),
                     pl.BlockSpec((1, 1, lanes_in), lambda n, i: (n, 0, 0))]
        args += [mean_t, rstd_t]

    y, stats = pl.pallas_call(
        kern,
        out_shape=(
            jax.ShapeDtypeStruct((N, H, lanes_out), out_dtype),
            jax.ShapeDtypeStruct((N, T, 1, 2 * Cout), jnp.float32),
        ),
        grid_spec=pltpu.PrefetchScalarGridSpec(
            num_scalar_prefetch=0,
            grid=(N, T),
            in_specs=in_specs,
            out_specs=[
                pl.BlockSpec((1, tile_h, lanes_out), lambda n, i: (n, i, 0)),
                pl.BlockSpec((1, 1, 1, 2 * Cout), lambda n, i: (n, i, 0, 0)),
            ],
        ),
        compiler_params=pltpu.CompilerParams(
            dimension_semantics=("parallel", "parallel"),
            vmem_limit_bytes=vmem_limit,
        ),
    )(*args)
    return y, stats


def _finalize_stats(stats, count):
    """stats (N, T, 1, 2*C) per-tile (sum|sumsq) -> per-sample (mean, rstd)."""
    C = stats.shape[-1] // 2
    s = jnp.sum(stats[:, :, 0, :C], axis=1)
    ss = jnp.sum(stats[:, :, 0, C:], axis=1)
    mean = s / count
    var = jnp.maximum(ss / count - mean * mean, 0.0)
    return mean, lax.rsqrt(var + EPS)


# ---------------------------------------------------------------------------
# ConvBlock forward
# ---------------------------------------------------------------------------
def conv_block_forward(x_nchw, w1_oihw, w2_oihw, drop_prob: float = 0.0, *,
                       tile_h=None, use_bf16_mxu=None):
    """ConvBlock.forward (eval mode).  Input/Output are NCHW like PyTorch."""
    # TODO(synk): training-mode Dropout2d (per-channel dropout) not implemented;
    # it is the identity at inference time.
    del drop_prob
    N, Cin, H, W = x_nchw.shape
    Cout = w1_oihw.shape[0]
    if H % 8 != 0:
        raise ValueError("H must be a multiple of 8 (TPU sublane tiling).")

    if use_bf16_mxu is None:
        use_bf16_mxu = _default_bf16_mxu()
    mm_dtype = jnp.bfloat16 if use_bf16_mxu else jnp.float32

    # Lane-dense padded row widths per layer (128-lane aligned when cheap).
    wp_in = _padded_width(W, Cin)
    wp_mid = _padded_width(W, Cout)

    cap = _tpu_vmem_capacity()
    if tile_h is None:
        tile_h = _pick_tile_h(H, W, Cout, wp_mid, wp_mid, N, (cap * 5) // 16)
    if H % tile_h != 0 or tile_h % 8 != 0:
        raise ValueError("tile_h must be a multiple of 8 that divides H.")
    in_bytes = 2 if use_bf16_mxu else 4
    need = max(_working_set_bytes(tile_h, W, Cin, Cout, wp_in, wp_mid, in_bytes),
               _working_set_bytes(tile_h, W, Cout, Cout, wp_mid, wp_mid, in_bytes))
    vmem_limit = _vmem_limit_bytes(need, cap)

    # NCHW -> lane-dense, W-zero-padded rows (N, H, wp_in*Cin).
    # TODO(synk): when chaining ConvBlocks inside the full UNet, keep
    # activations in this rows layout across blocks to avoid the NCHW
    # transpose/pad round-trips (they are a full HBM pass each).
    x = jnp.transpose(x_nchw, (0, 2, 3, 1))
    x = jnp.pad(x, ((0, 0), (0, 0), (1, wp_in - W - 1), (0, 0)))
    x = x.reshape(N, H, wp_in * Cin).astype(mm_dtype)

    # OIHW -> (dy, dx, cin) x cout; pre-cast once on the host to the MXU dtype.
    w1 = jnp.transpose(w1_oihw, (2, 3, 1, 0)).reshape(9 * Cin, Cout).astype(mm_dtype)
    w2 = jnp.transpose(w2_oihw, (2, 3, 1, 0)).reshape(9 * Cout, Cout).astype(mm_dtype)

    # ---- layer 1: conv only (its InstanceNorm+LeakyReLU are fused into the
    #      input path of layer 2, so the activated intermediate never hits
    #      HBM); the intermediate itself is stored in bf16 on the fast path.
    y1, st1 = _conv_pass(
        x, w1, None, None, W=W, Cin=Cin, Cout=Cout, tile_h=tile_h,
        wp_in=wp_in, wp_out=wp_mid, fuse_prenorm=False, use_bf16=use_bf16_mxu,
        out_dtype=mm_dtype, vmem_limit=vmem_limit)
    mean1, rstd1 = _finalize_stats(st1, H * W)             # (N, Cout) each

    # Broadcast per-channel mean/rstd across the padded row, zeroed on the
    # conv-padding columns so padded zeros stay zero after the fused prenorm.
    col = jnp.arange(wp_mid)
    col_valid = (col >= 1) & (col <= W)
    mean1_t = jnp.where(col_valid[None, :, None], mean1[:, None, :], 0.0)
    rstd1_t = jnp.where(col_valid[None, :, None], rstd1[:, None, :], 0.0)
    mean1_t = mean1_t.reshape(N, 1, wp_mid * Cout)
    rstd1_t = rstd1_t.reshape(N, 1, wp_mid * Cout)

    # ---- layer 2: normalize+LeakyReLU of y1 fused in-kernel, then conv.
    y2, st2 = _conv_pass(
        y1, w2, mean1_t, rstd1_t, W=W, Cin=Cout, Cout=Cout, tile_h=tile_h,
        wp_in=wp_mid, wp_out=wp_mid, fuse_prenorm=True, use_bf16=use_bf16_mxu,
        out_dtype=jnp.float32, vmem_limit=vmem_limit)
    mean2, rstd2 = _finalize_stats(st2, H * W)

    # ---- final InstanceNorm + LeakyReLU, fused by XLA with the mandatory
    #      epilogue (strip W pad, NHWC -> NCHW) so it costs no extra HBM pass.
    y2 = y2.reshape(N, H, wp_mid, Cout)[:, :, 1:W + 1, :]
    z = (y2 - mean2[:, None, None, :]) * rstd2[:, None, None, :]
    z = jnp.where(z >= 0, z, NEG_SLOPE * z)
    return jnp.transpose(z, (0, 3, 1, 2))


def _reference_block(x_nchw, w1_oihw, w2_oihw):
    """Pure-JAX reference (mirrors the PyTorch ConvBlock in eval mode)."""
    def layer(x, w):
        y = lax.conv_general_dilated(
            x, w, window_strides=(1, 1), padding="SAME",
            dimension_numbers=("NCHW", "OIHW", "NCHW"))
        mean = y.mean(axis=(2, 3), keepdims=True)
        var = ((y - mean) ** 2).mean(axis=(2, 3), keepdims=True)
        y = (y - mean) * lax.rsqrt(var + EPS)
        return jnp.where(y >= 0, y, NEG_SLOPE * y)
    return layer(layer(x_nchw, w1_oihw), w2_oihw)


if __name__ == "__main__":
    N, in_chans, out_chans, H, W = 2, 4, 8, 16, 16
    drop_prob = 0.1

    key = jax.random.PRNGKey(0)
    kx, k1, k2 = jax.random.split(key, 3)

    x = jax.random.normal(kx, (N, in_chans, H, W), jnp.float32)
    w1 = jax.random.normal(k1, (out_chans, in_chans, 3, 3), jnp.float32) * (
        1.0 / np.sqrt(in_chans * 9))
    w2 = jax.random.normal(k2, (out_chans, out_chans, 3, 3), jnp.float32) * (
        1.0 / np.sqrt(out_chans * 9))

    ref = jax.block_until_ready(_reference_block(x, w1, w2))

    # Tiled path (2 row tiles per image): exercises halo handling and the
    # cross-tile InstanceNorm partial-stat reduction.  f32 MXU inputs so the
    # result matches the f32 reference tightly.
    out = jax.block_until_ready(
        conv_block_forward(x, w1, w2, drop_prob, tile_h=8, use_bf16_mxu=False))
    assert out.shape == (N, out_chans, H, W), out.shape
    np.testing.assert_allclose(np.asarray(out), np.asarray(ref),
                               rtol=1e-4, atol=1e-4)

    # Auto (VMEM-budget-derived) tile size, f32 path.
    out2 = jax.block_until_ready(
        conv_block_forward(x, w1, w2, drop_prob, use_bf16_mxu=False))
    np.testing.assert_allclose(np.asarray(out2), np.asarray(ref),
                               rtol=1e-4, atol=1e-4)

    # bf16 MXU-input / bf16-intermediate fast path (the default on v6e/v7x);
    # sanity check only, since bf16 numerics do not meet the f32 tolerance.
    out_bf16 = jax.block_until_ready(
        conv_block_forward(x, w1, w2, drop_prob, tile_h=8, use_bf16_mxu=True))
    assert out_bf16.shape == (N, out_chans, H, W)
    assert bool(jnp.all(jnp.isfinite(out_bf16)))

    print("KERNEL_OK")
</pallas_src>

<mosaic_0001>
module attributes {stable_mosaic.version = 11 : i64} {
  func.func @_conv_tile_kernel(%arg0: i32, %arg1: i32, %arg2: memref<1x8x128xf32, #tpu.memory_space<vmem>>, %arg3: memref<1x8x128xf32, #tpu.memory_space<vmem>>, %arg4: memref<1x8x128xf32, #tpu.memory_space<vmem>>, %arg5: memref<36x8xf32, #tpu.memory_space<vmem>>, %arg6: memref<1x8x256xf32, #tpu.memory_space<vmem>>, %arg7: memref<1x1x1x16xf32, #tpu.memory_space<vmem>>) attributes {dimension_semantics = [#tpu.dimension_semantics<parallel>, #tpu.dimension_semantics<parallel>], iteration_bounds = array<i64: 2, 2>, scalar_prefetch = 0 : i64, scratch_operands = 0 : i64, tpu.core_type = #tpu.core_type<tc>, window_params = [{transform_indices = @transform_0, window_bounds = array<i64: 1, 8, 128>}, {transform_indices = @transform_1, window_bounds = array<i64: 1, 8, 128>}, {transform_indices = @transform_2, window_bounds = array<i64: 1, 8, 128>}, {pipeline_mode = #tpu.pipeline_mode<synchronous>, transform_indices = @transform_3, window_bounds = array<i64: 36, 8>}, {transform_indices = @transform_4, window_bounds = array<i64: 1, 8, 256>}, {transform_indices = @transform_5, window_bounds = array<i64: 1, 1, 1, 16>}]} {
    %c0 = arith.constant 0 : index
    %c7 = arith.constant 7 : index
    %c0_0 = arith.constant 0 : index
    %0 = vector.load %arg2[%c0, %c7, %c0_0] : memref<1x8x128xf32, #tpu.memory_space<vmem>>, vector<1x1x128xf32>
    %1 = vector.shape_cast %0 : vector<1x1x128xf32> to vector<1x128xf32>
    %c0_1 = arith.constant 0 : index
    %c0_2 = arith.constant 0 : index
    %c0_3 = arith.constant 0 : index
    %2 = vector.load %arg3[%c0_1, %c0_2, %c0_3] : memref<1x8x128xf32, #tpu.memory_space<vmem>>, vector<1x8x128xf32>
    %3 = vector.shape_cast %2 : vector<1x8x128xf32> to vector<8x128xf32>
    %c0_4 = arith.constant 0 : index
    %c0_5 = arith.constant 0 : index
    %c0_6 = arith.constant 0 : index
    %4 = vector.load %arg4[%c0_4, %c0_5, %c0_6] : memref<1x8x128xf32, #tpu.memory_space<vmem>>, vector<1x1x128xf32>
    %5 = vector.shape_cast %4 : vector<1x1x128xf32> to vector<1x128xf32>
    %c0_i32 = arith.constant 0 : i32
    %6 = arith.cmpi sgt, %arg1, %c0_i32 : i32
    %cst = arith.constant 0.000000e+00 : f32
    %7 = vector.broadcast %cst : f32 to vector<1x128xf32>
    %8 = arith.select %6, %1, %7 : vector<1x128xf32>
    %c1_i32 = arith.constant 1 : i32
    %9 = arith.cmpi slt, %arg1, %c1_i32 : i32
    %cst_7 = arith.constant 0.000000e+00 : f32
    %10 = vector.broadcast %cst_7 : f32 to vector<1x128xf32>
    %11 = arith.select %9, %5, %10 : vector<1x128xf32>
    %12 = tpu.concatenate %8, %3, %11 in 0 : vector<1x128xf32>, vector<8x128xf32>, vector<1x128xf32> -> vector<10x128xf32>
    %13 = vector.shape_cast %12 : vector<10x128xf32> to vector<10x32x4xf32>
    %14 = vector.extract_strided_slice %13 {offsets = [0, 0, 0], sizes = [8, 16, 4], strides = [1, 1, 1]} : vector<10x32x4xf32> to vector<8x16x4xf32>
    %15 = vector.extract_strided_slice %13 {offsets = [0, 1, 0], sizes = [8, 16, 4], strides = [1, 1, 1]} : vector<10x32x4xf32> to vector<8x16x4xf32>
    %16 = vector.extract_strided_slice %13 {offsets = [0, 2, 0], sizes = [8, 16, 4], strides = [1, 1, 1]} : vector<10x32x4xf32> to vector<8x16x4xf32>
    %17 = vector.extract_strided_slice %13 {offsets = [1, 0, 0], sizes = [8, 16, 4], strides = [1, 1, 1]} : vector<10x32x4xf32> to vector<8x16x4xf32>
    %18 = vector.extract_strided_slice %13 {offsets = [1, 1, 0], sizes = [8, 16, 4], strides = [1, 1, 1]} : vector<10x32x4xf32> to vector<8x16x4xf32>
    %19 = vector.extract_strided_slice %13 {offsets = [1, 2, 0], sizes = [8, 16, 4], strides = [1, 1, 1]} : vector<10x32x4xf32> to vector<8x16x4xf32>
    %20 = vector.extract_strided_slice %13 {offsets = [2, 0, 0], sizes = [8, 16, 4], strides = [1, 1, 1]} : vector<10x32x4xf32> to vector<8x16x4xf32>
    %21 = vector.extract_strided_slice %13 {offsets = [2, 1, 0], sizes = [8, 16, 4], strides = [1, 1, 1]} : vector<10x32x4xf32> to vector<8x16x4xf32>
    %22 = vector.extract_strided_slice %13 {offsets = [2, 2, 0], sizes = [8, 16, 4], strides = [1, 1, 1]} : vector<10x32x4xf32> to vector<8x16x4xf32>
    %23 = tpu.concatenate %14, %15, %16, %17, %18, %19, %20, %21, %22 in 2 : vector<8x16x4xf32>, vector<8x16x4xf32>, vector<8x16x4xf32>, vector<8x16x4xf32>, vector<8x16x4xf32>, vector<8x16x4xf32>, vector<8x16x4xf32>, vector<8x16x4xf32>, vector<8x16x4xf32> -> vector<8x16x36xf32>
    %24 = vector.shape_cast %23 : vector<8x16x36xf32> to vector<128x36xf32>
    %c0_8 = arith.constant 0 : index
    %c0_9 = arith.constant 0 : index
    %25 = vector.load %arg5[%c0_8, %c0_9] : memref<36x8xf32, #tpu.memory_space<vmem>>, vector<36x8xf32>
    %cst_10 = arith.constant dense<0.000000e+00> : vector<128x8xf32>
    %26 = tpu.matmul %24, %25, %cst_10 {dimension_numbers = #tpu.dot_dimension_numbers<[1], [0], [0], [1], [0, 0, 1, 1], [], []>} : vector<128x36xf32>, vector<36x8xf32>, vector<128x8xf32> -> vector<128x8xf32>
    %cst_11 = arith.constant dense<0.000000e+00> : vector<8xf32>
    %27 = vector.multi_reduction <add>, %26, %cst_11 [0] : vector<128x8xf32> to vector<8xf32>
    %28 = vector.shape_cast %27 : vector<8xf32> to vector<1x8xf32>
    %29 = arith.mulf %26, %26 : vector<128x8xf32>
    %cst_12 = arith.constant dense<0.000000e+00> : vector<8xf32>
    %30 = vector.multi_reduction <add>, %29, %cst_12 [0] : vector<128x8xf32> to vector<8xf32>
    %31 = vector.shape_cast %30 : vector<8xf32> to vector<1x8xf32>
    %32 = tpu.concatenate %28, %31 in 1 : vector<1x8xf32>, vector<1x8xf32> -> vector<1x16xf32>
    %33 = vector.shape_cast %32 : vector<1x16xf32> to vector<1x1x1x16xf32>
    %c0_13 = arith.constant 0 : index
    %c0_14 = arith.constant 0 : index
    %c0_15 = arith.constant 0 : index
    %c0_16 = arith.constant 0 : index
    %34 = vector.load %arg7[%c0_13, %c0_14, %c0_15, %c0_16] : memref<1x1x1x16xf32, #tpu.memory_space<vmem>>, vector<1x1x1x16xf32>
    tpu.vector_store %arg7[%c0_13, %c0_14, %c0_15, %c0_16], %33 {strides = array<i32>} : memref<1x1x1x16xf32, #tpu.memory_space<vmem>>, vector<1x1x1x16xf32>,
    %35 = vector.shape_cast %26 : vector<128x8xf32> to vector<8x16x8xf32>
    %cst_17 = arith.constant 0.000000e+00 : f32
    %36 = vector.broadcast %cst_17 : f32 to vector<8x1x8xf32>
    %cst_18 = arith.constant 0.000000e+00 : f32
    %37 = vector.broadcast %cst_18 : f32 to vector<8x15x8xf32>
    %38 = tpu.concatenate %36, %35, %37 in 1 : vector<8x1x8xf32>, vector<8x16x8xf32>, vector<8x15x8xf32> -> vector<8x32x8xf32>
    %39 = vector.shape_cast %38 : vector<8x32x8xf32> to vector<1x8x256xf32>
    %c0_19 = arith.constant 0 : index
    %c0_20 = arith.constant 0 : index
    %c0_21 = arith.constant 0 : index
    %40 = vector.load %arg6[%c0_19, %c0_20, %c0_21] : memref<1x8x256xf32, #tpu.memory_space<vmem>>, vector<1x8x256xf32>
    tpu.vector_store %arg6[%c0_19, %c0_20, %c0_21], %39 {strides = array<i32>} : memref<1x8x256xf32, #tpu.memory_space<vmem>>, vector<1x8x256xf32>,
    return
  }
  func.func @transform_0(%arg0: i32, %arg1: i32) -> (i32, i32, i32) {
    %c1_i32 = arith.constant 1 : i32
    %0 = arith.muli %arg1, %c1_i32 : i32
    %c1_i32_0 = arith.constant 1 : i32
    %1 = arith.subi %0, %c1_i32_0 : i32
    %c0_i32 = arith.constant 0 : i32
    %2 = arith.maxsi %1, %c0_i32 : i32
    %c0_i32_1 = arith.constant 0 : i32
    %c0_i32_2 = arith.constant 0 : i32
    return %arg0, %2, %c0_i32_1 : i32, i32, i32
  }
  func.func @transform_1(%arg0: i32, %arg1: i32) -> (i32, i32, i32) {
    %c0_i32 = arith.constant 0 : i32
    %c0_i32_0 = arith.constant 0 : i32
    return %arg0, %arg1, %c0_i32 : i32, i32, i32
  }
  func.func @transform_2(%arg0: i32, %arg1: i32) -> (i32, i32, i32) {
    %c1_i32 = arith.constant 1 : i32
    %0 = arith.addi %arg1, %c1_i32 : i32
    %c1_i32_0 = arith.constant 1 : i32
    %1 = arith.muli %0, %c1_i32_0 : i32
    %c1_i32_1 = arith.constant 1 : i32
    %2 = arith.minsi %1, %c1_i32_1 : i32
    %c0_i32 = arith.constant 0 : i32
    %c0_i32_2 = arith.constant 0 : i32
    return %arg0, %2, %c0_i32 : i32, i32, i32
  }
  func.func @transform_3(%arg0: i32, %arg1: i32) -> (i32, i32) {
    %c0_i32 = arith.constant 0 : i32
    %c0_i32_0 = arith.constant 0 : i32
    %c0_i32_1 = arith.constant 0 : i32
    return %c0_i32, %c0_i32_0 : i32, i32
  }
  func.func @transform_4(%arg0: i32, %arg1: i32) -> (i32, i32, i32) {
    %c0_i32 = arith.constant 0 : i32
    %c0_i32_0 = arith.constant 0 : i32
    return %arg0, %arg1, %c0_i32 : i32, i32, i32
  }
  func.func @transform_5(%arg0: i32, %arg1: i32) -> (i32, i32, i32, i32) {
    %c0_i32 = arith.constant 0 : i32
    %c0_i32_0 = arith.constant 0 : i32
    %c0_i32_1 = arith.constant 0 : i32
    return %arg0, %arg1, %c0_i32, %c0_i32_0 : i32, i32, i32, i32
  }
}

</mosaic_0001>

<bundles_post_ra>
// kernel: tpu_custom_call.1
= control target key start
LH: loop header
LB: loop body
LE: loop exit
PB: predicated region body
PF: predicated region fallthrough
CT: control target
= control target key end

     0   :  { %s5237_s0 = inlined_call_operand.vmem [shape: f32[2,16,128], index: 0, kind: input, shape index: {}]   ;;  %s5238_s1 = inlined_call_operand.hbm [shape: f32[2,16,128], index: 1, kind: input, shape index: {}]   ;;  %s5239_s2 = inlined_call_operand.hbm [shape: f32[2,16,128], index: 2, kind: input, shape index: {}]   ;;  %s5240_s3 = inlined_call_operand.vmem [shape: f32[36,8], index: 3, kind: input, shape index: {}]   ;;  %s5241_s4 = inlined_call_operand.hbm [shape: f32[2,16,256], index: 4, kind: output, shape index: {0}]   ;;  %s5242_s5 = inlined_call_operand.hbm [shape: f32[2,2,1,16], index: 5, kind: output, shape index: {1}]  }
   0x1   :  { %5322 = sst [smem:[#allocation33_spill]] %s5237_s0 }
   0x2   :  { %5323 = sst [smem:[#allocation34_spill]] %s5238_s1 }
   0x3   :  { %5324 = sst [smem:[#allocation35_spill]] %s5240_s3 }
   0x4   :  { %5325 = sst [smem:[#allocation36_spill]] %s5241_s4 }
   0x5   :  { %5326 = sst [smem:[#allocation37_spill]] %s5242_s5 }
   0x6   :  { %11 = vsyncpa [#allocation3], 0 }
   0x7   :  { %13 = vsyncpa [#allocation3 + $0x1], 0 }
   0x8   :  { %14 = vsyncpa [#allocation6], 0 }
   0x9   :  { %16 = vsyncpa [#allocation6 + $0x1], 0 }
   0xa   :  { %17 = vsyncpa [#allocation4], 0 }
   0xb   :  { %19 = vsyncpa [#allocation4 + $0x1], 0 }
   0xc   :  { %20 = vsyncpa [#allocation9], 0 }
   0xd   :  { %22 = vsyncpa [#allocation9 + $0x1], 0  ;;  %s3494_s18 = smov 0   ;;  %s3496_s19 = smov 0  }
   0xe   :  { %s3498_s20 = smov 0   ;;  %s3500_s21 = smov 0  }
   0xf   :  { %s3502_s22 = smov 0   ;;  %s3504_s23 = smov 0  }
  0x10   :  { %s3506_s24 = smov 0   ;;  %s3508_s25 = smov 0  }
  0x11   :  { %s3510_s26 = smov 0   ;;  %s3512_s27 = smov 0  }
  0x12   :  { %s3514_s28 = smov 0  }
  0x13 LB: > { %5327 = sst [smem:[#allocation14_spill]] %s3396_s21  ;;  %s2949_s29 = sadd.s32 4294967295, %s3424_s28   ;;  %s3424_s28 = sphi %s3514_s28, %s28_s28   ;;  %s3420_s27 = sphi %s3512_s27, %s5428_s27   ;;  %s3416_s26 = sphi %s3510_s26, %s5427_s26   ;;  %s3412_s25 = sphi %s3508_s25, %s5426_s25   ;;  %s3408_s24 = sphi %s3506_s24, %s5425_s24   ;;  %s3404_s23 = sphi %s3504_s23, %s5424_s23   ;;  %s3400_s22 = sphi %s3502_s22, %s5423_s22   ;;  %s3396_s21 = sphi %s3500_s21, %s5422_s21   ;;  %s3392_s20 = sphi %s3498_s20, %s5421_s20   ;;  %s3388_s19 = sphi %s3496_s19, %s5420_s19   ;;  %s3384_s18 = sphi %s3494_s18, %s5419_s18  }
  0x14   : > { %s2950_s30 = sadd.s32 4294967294, %s3424_s28   ;;  %s37_s6 = sadd.s32 1, %s3416_s26 }
  0x15   : > { %s40_s7 = sadd.s32 1, %s3420_s27  ;;  %p38_p0 = scmp.ge.s32.totalorder %s37_s6, 2 }
  0x16   : > { %s83_s8 = sadd.s32 1, %s3404_s23  ;;  %p90_p1 = scmp.ne.s32.totalorder %s3404_s23, %s3400_s22 }
  0x17   : > { %p5251_p2 = scmp.eq.s32.totalorder %s3424_s28, 0  ;;  %s5430_s6 = smov (%p38_p0, %s37_s6), 0 }
  0x18   : > { %5328 = sst [smem:[#allocation15_spill]] %s5430_s6  ;;  %s5432_s7 = smov (!%p38_p0, %s40_s7), %s3420_s27 }
  0x19   : > { %s79_s9 = ssub.s32 %s3416_s26, %s5430_s6  ;;  %p3564_p3 = por %p5251_p2, %p90_p1 }
  0x1a   : > { %p42_p4 = scmp.ge.s32.totalorder %s5432_s7, 2  ;;  %p96_p5 = scmp.ne.s32.totalorder %s3400_s22, %s3396_s21 }
  0x1b   : > { %p3570_p6 = scmp.eq.s32.totalorder %s2949_s29, 0  ;;  %p177_p7 = scmp.eq.s32.totalorder %s2949_s29, 3 }
  0x1c   : > { %s5434_s7 = smov (%p42_p4, %s5432_s7), 0  ;;  %p183_p10 = scmp.eq.s32.totalorder %s2950_s30, 3 }
  0x1d   : > { %5331 = sst [smem:[#allocation16_spill]] %s5434_s7  ;;  %p3578_p8 = por %p3570_p6, %p96_p5 }
  0x1e   : > { %p3582_p9 = por %p177_p7, %p90_p1  ;;  %s3588_s14 = ssub.s32 %s3420_s27, %s5434_s7 }
  0x1f   : > { %s5332_s12 = scalar_select %p3578_p8, 1, 0 }
  0x20   : > { %s5333_s13 = scalar_select %p3582_p9, 1, 0 }
  0x21   : > { %s80_s15 = sor.u32 %s79_s9, %s3588_s14  ;;  %p3591_p12 = por %p183_p10, %p96_p5 }
  0x22   : > { %5334 = sst [smem:[#allocation17_spill]] %s5333_s13  ;;  %p81_p11 = scmp.eq.s32.totalorder %s80_s15, 0 }
  0x23   : > { %s5335_s16 = scalar_select %p3591_p12, 1, 0 }
  0x24   : > { %p5252_p13 = scmp.lt.s32.totalorder %s3424_s28, 4  ;;  %s251_s17 = sand.u32 1, %s3404_s23  }
  0x25   : > { %s3598_s29 = scalar_select %p81_p11, %s3404_s23, %s83_s8  }
  0x26   : > { %s2955_s6 = sshll.u32 %s251_s17, 3  ;;  %s2956_s21 = sshll.u32 %s3420_s27, 1 }
  0x27   : > { %s260_s7 = sadd.s32 %s3416_s26, %s2956_s21  ;;  %s255_s4 = scalar_lea.vmem [#allocation2], %s2955_s6 }
  0x28   : > { %s264_s5 = sshll.u32 %s255_s4, 4  ;;  %s2957_s13 = sshll.u32 %s260_s7, 7  ;;  %s265_s5 = int_to_ptr.vmem [resolvable:$true] %s264_s5 }
  0x29   : > { %s5336_s1 = sld [smem:[#allocation34_spill]]  ;;  %p3609_p0 = pnand %p5252_p13, %p3564_p3 }
  0x2a   : > { %p2961_p1 = scmp.ge.s32.totalorder %s3424_s28, 1  ;;  %p292_p4 = scmp.lt.s32.totalorder %s3424_s28, 5 }
  0x2b   : > { %s252_s8 = scalar_lea.sflag [#allocation3], %s251_s17  ;;  %p3213_p5 = pneg %p3609_p0 }
  0x2c   : > { %s3224_s21 = scalar_lea.vmem %s265_s5, 128  ;;  %s3426_s4 = smov [#allocation2]  }
  0x2d   : > { %p3225_p7 = scmp.ne.s32.totalorder %s265_s5, %s3224_s21  ;;  %s3229_s6 = sshll.u32 %s3426_s4, 4  ;;  %s3230_s6 = int_to_ptr.vmem [resolvable:$false] %s3229_s6 }
  0x2e   : > { %s3231_s3 = scalar_lea.vmem %s3230_s6, 256  ;;  %p3232_p2 = scmp.lt.s32.totalorder %s265_s5, %s3230_s6 }
  0x2f   : > { %s262_s9 = scalar_lea.hbm %s5336_s1, %s2957_s13  ;;  %p3227_p10 = pnand %p3225_p7, %p3213_p5 }
  0x30   : > { %p3233_p12 = scmp.lt.s32.totalorder %s3231_s3, %s3224_s21 }
  0x31   : > { %p3228_p11 = pneg %p3227_p10 }
  0x32   : > { %p3234_p3 = por %p3233_p12, %p3232_p2 }
  0x34   : > { %p3235_p13 = pnand %p3234_p3, %p3228_p11 }
  0x36   : > { %3238 = shalt.err (!%p3235_p13)
}
  0x37   : > { %3076 = dma.hbm_to_vmem [thread:$0]  (!%p3609_p0), %s262_s9, 128, %s265_s5, %s252_s8  }
  0x38   : > { %p3623_p2 = pnand %p2961_p1, %p292_p4  ;;  %p124_p12 = scmp.ne.s32.totalorder %s3392_s20, %s3388_s19 }
  0x39   : > { %p130_p13 = scmp.ne.s32.totalorder %s3388_s19, %s3384_s18  ;;  %s271_s10 = sand.u32 1, %s3392_s20  }
  0x3a   : > { %s117_s13 = sadd.s32 1, %s3392_s20  ;;  %p115_p5 = scmp.eq.s32.totalorder %s3588_s14, 0 }
  0x3b   : > { %p3636_p7 = por %p130_p13, %p3570_p6  ;;  %p5340_p10 = scmp.eq.s32.totalorder %s3424_s28, 0 }
  0x3c   : > { %s2958_s5 = sshll.u32 %s271_s10, 3  ;;  %s3381_s9 = sshll.u32 %s3420_s27, 8 }
  0x3d   : > { %s5339_s17 = scalar_select %p3636_p7, 1, 0 }
  0x3e   : > { %p126_p11 = por %p124_p12, %p5340_p10  ;;  %s3380_s15 = sadd.s32 128, %s3381_s9 }
  0x3f   : > { %s3643_s30 = scalar_select %p115_p5, %s3392_s20, %s117_s13  }
  0x40   : > { %s275_s8 = scalar_lea.vmem [#allocation5], %s2958_s5  ;;  %s285_s18 = scalar_lea.hbm %s5239_s2, %s3380_s15 }
  0x41   : > { %s287_s21 = sshll.u32 %s275_s8, 4  ;;  %p5341_p0 = scmp.lt.s32.totalorder %s3424_s28, 4  ;;  %s288_s21 = int_to_ptr.vmem [resolvable:$true] %s287_s21 }
  0x42   : > { %s272_s14 = scalar_lea.sflag [#allocation6], %s271_s10  ;;  %s3239_s3 = scalar_lea.hbm %s285_s18, 128 }
  0x43   : > { %p3651_p1 = pnand %p5341_p0, %p126_p11  ;;  %p3240_p6 = scmp.ne.s32.totalorder %s285_s18, %s3239_s3 }
  0x44   : > { %s3244_s9 = scalar_lea.hbm %s5239_s2, 512 }
  0x45   : > { %p3241_p4 = pneg %p3651_p1  ;;  %p3246_p13 = scmp.lt.s32.totalorder %s3244_s9, %s3239_s3 }
  0x47   : > { %p3242_p3 = pnand %p3241_p4, %p3240_p6 }
  0x49   : > { %p3243_p12 = pneg %p3242_p3 }
  0x4b   : > { %p3248_p5 = pnand %p3246_p13, %p3243_p12 }
  0x4d   : > { %3251 = shalt.err (!%p3248_p5)
}
  0x4e   : > { %s3252_s15 = scalar_lea.vmem %s288_s21, 128  ;;  %s3427_s8 = smov [#allocation5]  }
  0x4f   : > { %p3253_p10 = scmp.ne.s32.totalorder %s288_s21, %s3252_s15  ;;  %s3257_s4 = sshll.u32 %s3427_s8, 4  ;;  %s3258_s4 = int_to_ptr.vmem [resolvable:$false] %s3257_s4 }
  0x50   : > { %s3259_s10 = scalar_lea.vmem %s3258_s4, 256  ;;  %p3260_p9 = scmp.lt.s32.totalorder %s288_s21, %s3258_s4 }
  0x51   : > { %p3255_p11 = pnand %p3253_p10, %p3241_p4  ;;  %p3261_p7 = scmp.lt.s32.totalorder %s3259_s10, %s3252_s15 }
  0x53   : > { %p3256_p0 = pneg %p3255_p11  ;;  %p3262_p8 = por %p3261_p7, %p3260_p9 }
  0x55   : > { %p3263_p6 = pnand %p3262_p8, %p3256_p0 }
  0x57   : > { %3266 = shalt.err (!%p3263_p6)
}
  0x58   : > { %3079 = dma.hbm_to_vmem [thread:$0]  (!%p3651_p1), %s285_s18, 128, %s288_s21, %s272_s14  }
  0x59   : > { %296 = sbr.rel (%p3623_p2) target bundleno = 1063 (0x427), region = 36 }
  0x5e   : > { %s3665_s6 = sand.u32 1, %s3400_s22   ;;  %p5343_p4 = scmp.ne.s32.totalorder %s5332_s12, 0 }
  0x5f   : > { %s2962_s3 = sshll.u32 %s3665_s6, 3  ;;  %s299_s13 = scalar_lea.sflag [#allocation3], %s3665_s6 }
  0x60   : > { %s302_s5 = scalar_lea.vmem [#allocation2], %s2962_s3 }
  0x61   : > { %3364 = dma.done.wait (%p5343_p4), %s299_s13, 128  }
  0x62   : > { %3366 = vsyncadd (%p5343_p4), %s299_s13, 4294967168  ;;  %s307_s21 = sand.u32 1, %s3388_s19   ;;  %p5344_p8 = scmp.ne.s32.totalorder %s5339_s17, 0 }
  0x63   : > { %s3674_s18 = sshll.u32 %s307_s21, 3  ;;  %s308_s7 = scalar_lea.sflag [#allocation6], %s307_s21 }
  0x64   : > { %s311_s11 = scalar_lea.vmem [#allocation5], %s3674_s18 }
  0x65   : > { %3368 = dma.done.wait (%p5344_p8), %s308_s7, 128  }
  0x66   : > { %3370 = vsyncadd (%p5344_p8), %s308_s7, 4294967168  ;;  %s2965_s14 = sadd.s32 4294967295, %s3408_s24  ;;  %p361_p9 = scmp.lt.s32.totalorder %s3412_s25, 1  ;;  %v3685_v0 = vld [vmem:[%s302_s5] sm:$0xff]  ;;  %vm394_vm1 = vcmask 1040384   ;;  %v542_v13 = vlaneseq  ;;  %vm1119_vm3 = vcmask 1046528  }
  0x67   : > { %p359_p2 = scmp.gt.s32.totalorder %s2965_s14, 0  ;;  %p2966_p7 = scmp.lt.s32.totalorder %s2965_s14, 1  ;;  %v389_v2 = vrot.slane %v3685_v0, 7  ;;  %v377_v7 = vld [vmem:[%s311_s11] sm:$0x1]  ;;  %vm1208_vm4 = vcmask 1045504  }
  0x68   : > { %s362_s12 = scalar_select %p361_p9, %s3412_s25, 1  ;;  %v3451_v11 = vmov 1983009808   ;;  %v543_v15 = vshrl.u32 %v542_v13, 7  ;;  %v3452_v25 = vmov 1934713408  }
  0x69   : > { %s5436_s14 = smov (!%p359_p2, %s2965_s14), 0  ;;  %p378_p1 = scmp.gt.s32.totalorder %s3408_s24, 0  ;;  %v540_v12 = vunpack.c.l.s4 %v3451_v11  ;;  %v604_v26 = vunpack.c.l.s4 %v3452_v25  ;;  %vm1801_vm5 = vcmask 1043456   ;;  %vm1611_vm6 = vcmask 31744  }
  0x6a   : > { %s2971_s9 = sshll.u32 %s362_s12, 1  ;;  %s5438_s14 = smov (!%p2966_p7, %s5436_s14), 1  ;;  %vm1628_vm7 = vcmask 64512   ;;  %vm1645_vm8 = vcmask 97280   ;;  %vm1662_vm9 = vcmask 130048   ;;  %vm1679_vm10 = vcmask 162816  }
  0x6b   : > { %s379_s15 = scalar_select %p378_p1, 1, 0  ;;  %v541_v14 = vunpack.c.0.s8 %v540_v12  ;;  %v605_v34 = vunpack.c.0.s8 %v604_v26  ;;  %vm1696_vm11 = vcmask 195584   ;;  %vm1713_vm12 = vcmask 228352  }
  0x6c   : > { %s366_s8 = sadd.s32 %s5438_s14, %s2971_s9  ;;  %s5345_s0 = sld [smem:[#allocation33_spill]]  ;;  %vm1730_vm13 = vcmask 261120   ;;  %vm1752_vm14 = vcmask 293888   ;;  %vm2715_vm15 = vcmask 326656  }
  0x6d   : > { %s2972_s4 = sshll.u32 %s366_s8, 3  ;;  %v380_v1 = vstv %s379_s15  ;;  %s3428_s13 = smov 116   ;;  %v3786_v18 = vsub.s32 %v541_v14, %v543_v15  ;;  %v3816_v45 = vsub.s32 %v605_v34, %v543_v15 }
  0x6e   : > { %vm381_vm0 = vcmp.eq.s32.totalorder %v380_v1, 1  ;;  %s3429_s5 = smov 124   ;;  %s5276_s21 = smov 112  }
  0x6f   : > { %s5274_s7 = smov 120   ;;  %s5261_s14 = smov 104   ;;  %5356 = vst [vmem:[#allocation18_spill] sm:$0xff] %v3786_v18  ;;  %5357 = vst [vmem:[#allocation19_spill] sm:$0xff] %v3816_v45 }
  0x70   : > { %s3433_s12 = smov 108   ;;  %s5256_s9 = smov 96  }
  0x71   : > { %s3435_s15 = smov 100   ;;  %s5258_s8 = smov 88  }
  0x72   : > { %s368_s3 = scalar_lea.vmem %s5345_s0, %s2972_s4  ;;  %s5260_s4 = smov 92  }
  0x73   : > { %v375_v3 = vld [vmem:[%s368_s3 + $0x7] sm:$0x1]  ;;  %s5263_s17 = smov 80   ;;  %s3439_s10 = smov 84  }
  0x74   : > { %v382_v4 = vsel %vm381_vm0, %v375_v3, 0.0  ;;  %p383_p3 = scmp.lt.s32.totalorder %s3408_s24, 1  ;;  %s5265_s3 = smov 72   ;;  %vm2717_vm0 = vcmask 392192  }
  0x75   : > { %v3692_v5 = vsel %vm394_vm1, %v382_v4, %v389_v2  ;;  %s5270_s18 = smov 40   ;;  %s3449_s11 = smov 44  }
  0x76   : > { %411 = vrot.lane.b32.xlu1 %v3692_v5, %s3428_s13  ;;  %399 = vrot.lane.b32.xlu0 %v3692_v5, %s3429_s5  ;;  %s5375_s0 = smov 4   ;;  %s5376_s1 = smov 28  }
  0x7a   : > { %417 = vrot.lane.b32.xlu1 %v3692_v5, %s5276_s21  ;;  %405 = vrot.lane.b32.xlu0 %v3692_v5, %s5274_s7 }
  0x7e   : > { %429 = vrot.lane.b32.xlu1 %v3692_v5, %s5261_s14  ;;  %423 = vrot.lane.b32.xlu0 %v3692_v5, %s3433_s12  ;;  %s3443_s14 = smov 68  }
  0x82   : > { %441 = vrot.lane.b32.xlu1 %v3692_v5, %s5256_s9  ;;  %435 = vrot.lane.b32.xlu0 %v3692_v5, %s3435_s15  ;;  %s5267_s9 = smov 76  }
  0x86   : > { %453 = vrot.lane.b32.xlu1 %v3692_v5, %s5258_s8  ;;  %447 = vrot.lane.b32.xlu0 %v3692_v5, %s5260_s4  ;;  %s384_s8 = scalar_select %p383_p3, 1, 0 }
  0x87   : > { %s5268_s4 = smov 64  }
  0x88   : > { %v385_v6 = vstv %s384_s8  ;;  %s3450_s8 = smov 36  }
  0x89   : > { %vm386_vm2 = vcmp.eq.s32.totalorder %v385_v6, 1 }
  0x8a   : > { %465 = vrot.lane.b32.xlu1 %v3692_v5, %s5263_s17  ;;  %459 = vrot.lane.b32.xlu0 %v3692_v5, %s3439_s10  ;;  %s5278_s17 = smov 56   ;;  %v387_v8 = vsel %vm386_vm2, %v377_v7, 0.0  ;;  %vm2721_vm2 = vcmask 523264  }
  0x8b   : > { %v392_v9 = vrot.slane %v387_v8, 7 }
  0x8d   : > { %v3740_v10 = vsel %vm394_vm1, %v389_v2, %v392_v9 }
  0x8e   : > { %477 = vrot.lane.b32.xlu1 %v3692_v5, %s5265_s3  ;;  %471 = vrot.lane.b32.xlu0 %v3692_v5, %s5267_s9  ;;  %s3445_s3 = smov 60   ;;  %s5272_s9 = smov 48  }
  0x92   : > { %489 = vrot.lane.b32.xlu1 %v3692_v5, %s5268_s4  ;;  %483 = vrot.lane.b32.xlu0 %v3692_v5, %s3443_s14  ;;  %s3447_s4 = smov 52  }
  0x96   : > { %501 = vrot.lane.b32.xlu1 %v3692_v5, %s5278_s17  ;;  %495 = vrot.lane.b32.xlu0 %v3692_v5, %s3445_s3 }
  0x9a   : > { %513 = vrot.lane.b32.xlu1 %v3692_v5, %s5272_s9  ;;  %507 = vrot.lane.b32.xlu0 %v3692_v5, %s3447_s4  ;;  %s5347_s9 = smov 92  }
  0x9e   : > { %525 = vrot.lane.b32.xlu1 %v3692_v5, %s5270_s18  ;;  %519 = vrot.lane.b32.xlu0 %v3692_v5, %s3449_s11  ;;  %s5346_s18 = smov 104  }
  0xa2   : > { %531 = vrot.lane.b32.xlu0 %v3692_v5, %s3450_s8  ;;  %401 = vrot.lane.b32.xlu1 %v3740_v10, %s3429_s5  ;;  %s5348_s5 = smov 96  }
  0xa6   : > { %413 = vrot.lane.b32.xlu1 %v3740_v10, %s3428_s13  ;;  %407 = vrot.lane.b32.xlu0 %v3740_v10, %s5274_s7  ;;  %s5349_s13 = smov 88   ;;  %s5351_s7 = smov 80  }
  0xaa   : > { %425 = vrot.lane.b32.xlu1 %v3740_v10, %s3433_s12  ;;  %419 = vrot.lane.b32.xlu0 %v3740_v10, %s5276_s21  ;;  %s5350_s12 = smov 76   ;;  %s5365_s21 = smov 8  }
  0xae   : > { %437 = vrot.lane.b32.xlu1 %v3740_v10, %s3435_s15  ;;  %431 = vrot.lane.b32.xlu0 %v3740_v10, %s5346_s18  ;;  %s5352_s15 = smov 72  }
  0xb2   : > { %449 = vrot.lane.b32.xlu1 %v3740_v10, %s5347_s9  ;;  %443 = vrot.lane.b32.xlu0 %v3740_v10, %s5348_s5  ;;  %s5353_s9 = smov 64  }
  0xb6   : > { %461 = vrot.lane.b32.xlu1 %v3740_v10, %s3439_s10  ;;  %455 = vrot.lane.b32.xlu0 %v3740_v10, %s5349_s13  ;;  %s5354_s10 = smov 48  }
  0xba   : > { %473 = vrot.lane.b32.xlu1 %v3740_v10, %s5350_s12  ;;  %467 = vrot.lane.b32.xlu0 %v3740_v10, %s5351_s7  ;;  %s5284_s12 = smov 16  }
  0xbe   : > { %485 = vrot.lane.b32.xlu1 %v3740_v10, %s3443_s14  ;;  %479 = vrot.lane.b32.xlu0 %v3740_v10, %s5352_s15  ;;  %s5355_s14 = smov 40  }
  0xc2   : > { %497 = vrot.lane.b32.xlu1 %v3740_v10, %s3445_s3  ;;  %491 = vrot.lane.b32.xlu0 %v3740_v10, %s5353_s9  ;;  %s5282_s3 = smov 24  }
  0xc6   : > { %509 = vrot.lane.b32.xlu1 %v3740_v10, %s3447_s4  ;;  %503 = vrot.lane.b32.xlu0 %v3740_v10, %s5278_s17  ;;  %s5280_s4 = smov 12   ;;  %s5370_s17 = smov 20  }
  0xca   : > { %521 = vrot.lane.b32.xlu1 %v3740_v10, %s3449_s11  ;;  %515 = vrot.lane.b32.xlu0 %v3740_v10, %s5354_s10  ;;  %s5292_s11 = smov 4  }
  0xce   : > { %533 = vrot.lane.b32.xlu1 %v3740_v10, %s3450_s8  ;;  %527 = vrot.lane.b32.xlu0 %v3740_v10, %s5355_s14  ;;  %s5286_s8 = smov 8  }
  0xe8   : > { %v412_v16 = vpop.permute.xlu1 %411  ;;  %v400_v17 = vpop.permute.xlu0 %399 }
  0xe9   : > { %v554_v19 = vcombine.high %v400_v17, %v412_v16  ;;  %v553_v31 = vcombine.low %v400_v17, %v412_v16 }
  0xeb   : > { %v3790_v23 = vrot.slane %v554_v19, %v3786_v18  ;;  %v3802_v40 = vrot.slane %v553_v31, %v3786_v18 }
  0xec   : > { %v418_v20 = vpop.permute.xlu1 %417  ;;  %v406_v21 = vpop.permute.xlu0 %405 }
  0xed   : > { %v538_v22 = vcombine.high %v3692_v5, %v406_v21  ;;  %v537_v29 = vcombine.low %v3692_v5, %v406_v21 }
  0xef   : > { %v3793_v24 = vrot.slane %v538_v22, %v3786_v18  ;;  %v3799_v37 = vrot.slane %v537_v29, %v3786_v18 }
  0xf0   : > { %v430_v27 = vpop.permute.xlu1 %429  ;;  %v424_v28 = vpop.permute.xlu0 %423 }
  0xf1   : > { %v618_v30 = vcombine.high %v3793_v24, %v3790_v23  ;;  %v569_v32 = vcombine.low %v418_v20, %v430_v27  ;;  %v570_v33 = vcombine.high %v418_v20, %v430_v27  ;;  %v601_v48 = vcombine.low %v3799_v37, %v3802_v40 }
  0xf3   : > { %v3805_v41 = vrot.slane %v569_v32, %v3786_v18  ;;  %v3808_v42 = vrot.slane %v570_v33, %v3786_v18  ;;  %v632_v53 = vrot.slane %v618_v30, %v3816_v45  ;;  %v609_v57 = vrot.slane %v601_v48, %v3816_v45 }
  0xf4   : > { %v442_v35 = vpop.permute.xlu1 %441  ;;  %v436_v36 = vpop.permute.xlu0 %435 }
  0xf5   : > { %v585_v38 = vcombine.low %v424_v28, %v436_v36  ;;  %v586_v39 = vcombine.high %v424_v28, %v436_v36 }
  0xf7   : > { %v3811_v43 = vrot.slane %v585_v38, %v3786_v18  ;;  %v3814_v44 = vrot.slane %v586_v39, %v3786_v18  ;;  %v602_v38 = vcombine.high %v3799_v37, %v3802_v40 }
  0xf8   : > { %v454_v46 = vpop.permute.xlu1 %453  ;;  %v448_v47 = vpop.permute.xlu0 %447 }
  0xf9   : > { %v633_v49 = vcombine.low %v3805_v41, %v3811_v43  ;;  %v650_v50 = vcombine.high %v3808_v42, %v3814_v44  ;;  %v674_v54 = vcombine.high %v442_v35, %v454_v46  ;;  %v673_v63 = vcombine.low %v442_v35, %v454_v46 }
  0xfa   : > { %v634_v28 = vcombine.high %v3805_v41, %v3811_v43 }
  0xfb   : > { %v664_v51 = vrot.slane %v650_v50, %v3816_v45  ;;  %v3826_v52 = vrot.slane %v633_v49, %v3816_v45  ;;  %v3838_v0 = vrot.slane %v674_v54, %v3786_v18  ;;  %v681_v8 = vrot.slane %v673_v63, %v3786_v18 }
  0xfc   : > { %v466_v55 = vpop.permute.xlu1 %465  ;;  %v460_v56 = vpop.permute.xlu0 %459  ;;  %v3878_v50 = vrot.slane %v634_v28, %v3816_v45 }
  0xfd   : > { %v3830_v58 = vcombine.low %v632_v53, %v664_v51  ;;  %v3832_v59 = vcombine.high %v632_v53, %v664_v51  ;;  %v689_v60 = vcombine.low %v448_v47, %v460_v56  ;;  %v690_v61 = vcombine.high %v448_v47, %v460_v56 }
  0xfe   : > { %v3835_v62 = vcombine.high %v609_v57, %v3826_v52 }
  0xff   : > { %v3841_v1 = vrot.slane %v690_v61, %v3786_v18  ;;  %v697_v4 = vrot.slane %v689_v60, %v3786_v18  ;;  %v3893_v60 = vcombine.low %v609_v57, %v3826_v52  ;;  %v3896_v61 = vrot.slane %v602_v38, %v3816_v45 }
 0x100   : > { %v478_v2 = vpop.permute.xlu1 %477  ;;  %v472_v3 = vpop.permute.xlu0 %471  ;;  %1299 = vrot.lane.b32.xlu0 %v3835_v62, %s5280_s4 }
 0x101   : > { %v754_v5 = vcombine.high %v3838_v0, %v3841_v1  ;;  %v705_v6 = vcombine.low %v466_v55, %v478_v2  ;;  %v706_v7 = vcombine.high %v466_v55, %v478_v2  ;;  %v738_v14 = vcombine.high %v681_v8, %v697_v4 }
 0x102   : > { %v737_v22 = vcombine.low %v681_v8, %v697_v4  ;;  %v3906_v4 = vcombine.low %v3896_v61, %v3878_v50 }
 0x103   : > { %v713_v15 = vrot.slane %v705_v6, %v3786_v18  ;;  %v3851_v16 = vrot.slane %v706_v7, %v3786_v18  ;;  %v752_v29 = vrot.slane %v738_v14, %v3816_v45  ;;  %v768_v33 = vrot.slane %v754_v5, %v3816_v45 }
 0x104   : > { %v490_v9 = vpop.permute.xlu1 %489  ;;  %v484_v11 = vpop.permute.xlu0 %483  ;;  %v745_v41 = vrot.slane %v737_v22, %v3816_v45  ;;  %5362 = vst [vmem:[#allocation24_spill] sm:$0xff] %v3906_v4  ;;  %v1120_v7 = vrot.slane %v3893_v60, 1 }
 0x105   : > { %v721_v12 = vcombine.low %v472_v3, %v484_v11  ;;  %v722_v13 = vcombine.high %v472_v3, %v484_v11 }
 0x107   : > { %v729_v17 = vrot.slane %v721_v12, %v3786_v18  ;;  %v3855_v19 = vrot.slane %v722_v13, %v3786_v18 }
 0x108   : > { %v502_v20 = vpop.permute.xlu1 %501  ;;  %v496_v21 = vpop.permute.xlu0 %495 }
 0x109   : > { %v769_v25 = vcombine.low %v713_v15, %v729_v17  ;;  %v770_v26 = vcombine.high %v713_v15, %v729_v17  ;;  %v786_v27 = vcombine.high %v3851_v16, %v3855_v19  ;;  %v810_v34 = vcombine.high %v490_v9, %v502_v20 }
 0x10a   : > { %v809_v51 = vcombine.low %v490_v9, %v502_v20 }
 0x10b   : > { %v784_v30 = vrot.slane %v770_v26, %v3816_v45  ;;  %v800_v31 = vrot.slane %v786_v27, %v3816_v45  ;;  %v777_v32 = vrot.slane %v769_v25, %v3816_v45  ;;  %v3887_v53 = vrot.slane %v810_v34, %v3786_v18 }
 0x10c   : > { %v514_v35 = vpop.permute.xlu1 %513  ;;  %v508_v36 = vpop.permute.xlu0 %507  ;;  %v817_v57 = vrot.slane %v809_v51, %v3786_v18 }
 0x10d   : > { %v3868_v39 = vcombine.low %v752_v29, %v784_v30  ;;  %v3870_v46 = vcombine.high %v752_v29, %v784_v30  ;;  %v3873_v43 = vcombine.low %v768_v33, %v800_v31  ;;  %v3875_v47 = vcombine.high %v768_v33, %v800_v31 }
 0x10e   : > { %v825_v48 = vcombine.low %v496_v21, %v508_v36  ;;  %v826_v49 = vcombine.high %v496_v21, %v508_v36  ;;  %v3882_v37 = vcombine.high %v745_v41, %v777_v32  ;;  %v3884_v40 = vcombine.low %v745_v41, %v777_v32 }
 0x10f   : > { %5358 = vst [vmem:[#allocation20_spill] sm:$0xff] %v3868_v39  ;;  %5359 = vst [vmem:[#allocation21_spill] sm:$0xff] %v3870_v46  ;;  %1458 = vrot.lane.b32.xlu0 %v3868_v39, %s5282_s3  ;;  %v1209_v21 = vrot.slane %v3893_v60, 2  ;;  %v1125_v30 = vrot.slane %v3835_v62, 1 }
 0x110   : > { %5360 = vst [vmem:[#allocation22_spill] sm:$0xff] %v3873_v43  ;;  %5361 = vst [vmem:[#allocation23_spill] sm:$0xff] %v3882_v37  ;;  %v3890_v54 = vrot.slane %v826_v49, %v3786_v18  ;;  %v526_v55 = vpop.permute.xlu1 %525  ;;  %v520_v56 = vpop.permute.xlu0 %519  ;;  %1301 = vrot.lane.b32.xlu1 %v3882_v37, %s5280_s4  ;;  %v833_v63 = vrot.slane %v825_v48, %v3786_v18  ;;  %v1121_v3 = vrot.slane %v3884_v40, 1  ;;  %v1210_v13 = vrot.slane %v3884_v40, 2 }
 0x111   : > { %v841_v5 = vcombine.low %v514_v35, %v526_v55  ;;  %v842_v52 = vcombine.high %v514_v35, %v526_v55  ;;  %v1126_v27 = vrot.slane %v3882_v37, 1 }
 0x112   : > { %v890_v2 = vcombine.high %v3887_v53, %v3890_v54  ;;  %v873_v11 = vcombine.low %v817_v57, %v833_v63  ;;  %v1122_v12 = vsel %vm1119_vm3, %v1120_v7, %v1121_v3  ;;  %v1211_v26 = vsel %vm1208_vm4, %v1209_v21, %v1210_v13 }
 0x113   : > { %1305 = vrot.lane.b32.xlu0 %v3868_v39, %s5280_s4  ;;  %v849_v14 = vrot.slane %v841_v5, %v3786_v18  ;;  %v3918_v15 = vrot.slane %v842_v52, %v3786_v18  ;;  %v1127_v33 = vsel %vm1119_vm3, %v1125_v30, %v1126_v27  ;;  %v874_v49 = vcombine.high %v817_v57, %v833_v63 }
 0x114   : > { %v532_v6 = vpop.permute.xlu0 %531  ;;  %1456 = vrot.lane.b32.xlu1 %v3906_v4, %s5282_s3  ;;  %v881_v28 = vrot.slane %v873_v11, %v3816_v45  ;;  %v904_v55 = vrot.slane %v890_v2, %v3816_v45  ;;  %v1215_v57 = vrot.slane %v3882_v37, 2  ;;  %v5299_v7 = vrot.slane %v3873_v43, 1  ;;  %s5367_s3 = smov 16  }
 0x115   : > { %v857_v8 = vcombine.low %v520_v56, %v532_v6  ;;  %v858_v9 = vcombine.high %v520_v56, %v532_v6  ;;  %v3950_v52 = vrot.slane %v874_v49, %v3816_v45  ;;  %v649_v49 = vcombine.low %v3808_v42, %v3814_v44 }
 0x117   : > { %v865_v17 = vrot.slane %v857_v8, %v3786_v18  ;;  %v3922_v20 = vrot.slane %v858_v9, %v3786_v18  ;;  %1160 = vrot.lane.b32.xlu0 %v1122_v12, %s5292_s11  ;;  %v5298_v12 = vrot.slane %v3873_v43, 2 }
 0x118   : > { %1303 = vrot.lane.b32.xlu1 %v3906_v4, %s5280_s4  ;;  %s5363_s4 = sld [smem:[#allocation35_spill]] }
 0x119   : > { %v905_v22 = vcombine.low %v849_v14, %v865_v17  ;;  %v922_v25 = vcombine.high %v3918_v15, %v3922_v20  ;;  %v906_v36 = vcombine.high %v849_v14, %v865_v17  ;;  %v1214_v17 = vrot.slane %v3835_v62, 2 }
 0x11b   : > { %v913_v29 = vrot.slane %v905_v22, %v3816_v45  ;;  %1249 = vrot.lane.b32.xlu0 %v1211_v26, %s5286_s8  ;;  %v936_v51 = vrot.slane %v922_v25, %v3816_v45  ;;  %v3945_v56 = vrot.slane %v906_v36, %v3816_v45  ;;  %v5297_v22 = vrot.slane %v3875_v47, 1 }
 0x11d   : > { %v937_v31 = vcombine.low %v881_v28, %v913_v29  ;;  %v938_v32 = vcombine.high %v881_v28, %v913_v29  ;;  %v943_v63 = vcombine.low %v904_v55, %v936_v51  ;;  %v944_v6 = vcombine.high %v904_v55, %v936_v51 }
 0x11e   : > { %v3956_v2 = vcombine.low %v3950_v52, %v3945_v56  ;;  %v1751_v9 = vld [vmem:[%s5363_s4 + $0x20] sm:$0xf]  ;;  %v1216_v29 = vsel %vm1208_vm4, %v1214_v17, %v1215_v57  ;;  %v1749_v30 = vld [vmem:[%s5363_s4 + $0x10] sm:$0xff]  ;;  %v753_v51 = vcombine.low %v3838_v0, %v3841_v1  ;;  %v657_v0 = vrot.slane %v649_v49, %v3816_v45 }
 0x11f   : > { %1353 = vrot.lane.b32.xlu0 %v1127_v33, %s5284_s12  ;;  %v1123_v34 = vrot.slane %v937_v31, 1  ;;  %v1128_v35 = vrot.slane %v938_v32, 1  ;;  %v1212_v48 = vrot.slane %v937_v31, 2  ;;  %v1153_v8 = vrot.slane %v943_v63, 1  ;;  %3021 = vmatprep.subr.msk.mxu0 %vm1801_vm5, %v1751_v9  ;;  %v1747_v36 = vld [vmem:[%s5363_s4] sm:$0xff] }
 0x120   : > { %v1242_v14 = vrot.slane %v943_v63, 2  ;;  %v1158_v25 = vrot.slane %v944_v6, 1  ;;  %3022 = vmatpush3.msk.msra.mxu0 %vm1801_vm5, %v1751_v9  ;;  %v1247_v28 = vrot.slane %v944_v6, 2  ;;  %3055 = vmatprep.subr.msk.mxu1 %vm1801_vm5, %v1751_v9  ;;  %v761_v1 = vrot.slane %v753_v51, %v3816_v45  ;;  %v4051_v6 = vpop.permute.xlu0 %407 }
 0x121   : > { %v1124_v38 = vsel %vm1119_vm3, %v1121_v3, %v1123_v34  ;;  %v1129_v41 = vsel %vm1119_vm3, %v1126_v27, %v1128_v35  ;;  %v1213_v5 = vsel %vm1208_vm4, %v1210_v13, %v1212_v48  ;;  %v1217_v3 = vrot.slane %v938_v32, 2  ;;  %v1750_v13 = vld [vmem:[%s5363_s4 + $0x18] sm:$0xff]  ;;  %3060 = vmatpush3.msk.msra.mxu1 %vm1801_vm5, %v1751_v9  ;;  %v4054_v9 = vpop.permute.xlu1 %401 }
 0x122   : > { %1162 = vrot.lane.b32.xlu1 %v1124_v38, %s5292_s11  ;;  %v3973_v21 = vsel %vm1119_vm3, %v5299_v7, %v1153_v8  ;;  %v3981_v26 = vsel %vm1208_vm4, %v5298_v12, %v1242_v14  ;;  %v5296_v27 = vrot.slane %v3875_v47, 2  ;;  %3023 = vmatprep.subr.mxu0 %v1750_v13  ;;  %v3992_v31 = vsel %vm1119_vm3, %v5297_v22, %v1158_v25 }
 0x123   : > { %1355 = vrot.lane.b32.xlu0 %v1129_v41, %s5284_s12  ;;  %v1218_v11 = vsel %vm1208_vm4, %v1215_v57, %v1217_v3  ;;  %v1133_v32 = vrot.slane %v3956_v2, 1  ;;  %3024 = vmatpush3.msra.mxu0 %v1750_v13  ;;  %v1131_v35 = vrot.slane %v3868_v39, 1  ;;  %v785_v38 = vcombine.low %v3851_v16, %v3855_v19  ;;  %s5290_s12 = smov 32  }
 0x124   : > { %v4003_v34 = vsel %vm1208_vm4, %v5296_v27, %v1247_v28  ;;  %3025 = vmatprep.subr.mxu0 %v1749_v30  ;;  %3056 = vmatprep.subr.mxu1 %v1750_v13  ;;  %v1130_v16 = vrot.slane %v3906_v4, 1  ;;  %v889_v19 = vcombine.low %v3887_v53, %v3890_v54  ;;  %v1220_v54 = vrot.slane %v3868_v39, 2  ;;  %v4071_v28 = vpop.permute.xlu0 %419 }
 0x125   : > { %5364 = vst [vmem:[#allocation25_spill] sm:$0xff] %v4003_v34  ;;  %3026 = vmatpush3.msra.mxu0 %v1749_v30  ;;  %3061 = vmatpush3.msra.mxu1 %v1750_v13  ;;  %v1134_v48 = vsel %vm1119_vm3, %v1131_v35, %v1133_v32  ;;  %v1222_v55 = vrot.slane %v3956_v2, 2  ;;  %v1219_v63 = vrot.slane %v3906_v4, 2  ;;  %5369 = vst [vmem:[#allocation28_spill] sm:$0xff] %v4071_v28  ;;  %v5379_v4 = vrot.slane %v3873_v43, 1 }
 0x126   : > { %1251 = vrot.lane.b32.xlu1 %v1213_v5, %s5286_s8  ;;  %s5288_s8 = smov 20   ;;  %3057 = vmatprep.subr.mxu1 %v1749_v30  ;;  %v1132_v42 = vsel %vm1119_vm3, %v1130_v16, %v1131_v35  ;;  %vm2727_vm5 = vcmask 719872  }
 0x127   : > { %1166 = vrot.lane.b32.xlu0 %v1129_v41, %s5292_s11  ;;  %v921_v41 = vcombine.low %v3918_v15, %v3922_v20  ;;  %v617_v15 = vcombine.low %v3793_v24, %v3790_v23  ;;  %v793_v20 = vrot.slane %v785_v38, %v3816_v45  ;;  %3062 = vmatpush3.msra.mxu1 %v1749_v30 }
 0x128   : > { %v4036_v23 = vrot.slane %v889_v19, %v3816_v45  ;;  %v1221_v57 = vsel %vm1208_vm4, %v1219_v63, %v1220_v54  ;;  %v1223_v2 = vsel %vm1208_vm4, %v1220_v54, %v1222_v55  ;;  %v4086_v35 = vpop.permute.xlu0 %431  ;;  %v1225_v55 = vrot.slane %v3870_v46, 2 }
 0x129   : > { %v4029_v44 = vrot.slane %v921_v41, %v3816_v45  ;;  %v625_v24 = vrot.slane %v617_v15, %v3816_v45  ;;  %v4039_v53 = vcombine.low %v761_v1, %v793_v20  ;;  %v4112_v19 = vcombine.high %v761_v1, %v793_v20 }
 0x12a   : > { %1164 = vrot.lane.b32.xlu1 %v1127_v33, %s5292_s11  ;;  %v1748_v33 = vld [vmem:[%s5363_s4 + $0x8] sm:$0xff] }
 0x12b   : > { %1408 = vrot.lane.b32.xlu0 %v1218_v11, %s5288_s8  ;;  %3027 = vmatprep.subr.mxu0 %v1748_v33  ;;  %5366 = vst [vmem:[#allocation26_spill] sm:$0xff] %v4039_v53  ;;  %v941_v5 = vcombine.low %v4036_v23, %v4029_v44  ;;  %v4046_v3 = vcombine.low %v625_v24, %v657_v0  ;;  %v1141_v8 = vrot.slane %v4039_v53, 1  ;;  %v1230_v25 = vrot.slane %v4039_v53, 2 }
 0x12c   : > { %3028 = vmatpush3.msra.mxu0 %v1748_v33  ;;  %3058 = vmatprep.subr.mxu1 %v1748_v33  ;;  %v4097_v49 = vpop.permute.xlu0 %443 }
 0x12d   : > { %3029 = vmatprep.subr.mxu0 %v1747_v36  ;;  %3063 = vmatpush3.msra.mxu1 %v1748_v33  ;;  %5368 = vst [vmem:[#allocation27_spill] sm:$0xff] %v4046_v3  ;;  %v1140_v13 = vrot.slane %v4046_v3, 1  ;;  %v1229_v30 = vrot.slane %v4046_v3, 2  ;;  %v4084_v33 = vcombine.high %v3896_v61, %v3878_v50  ;;  %v1232_v38 = vrot.slane %v941_v5, 2 }
 0x12e   : > { %1406 = vrot.lane.b32.xlu1 %v1216_v29, %s5288_s8  ;;  %s5294_s8 = smov 28   ;;  %3030 = vmatpush3.msra.mxu0 %v1747_v36  ;;  %v4103_v61 = vcombine.high %v625_v24, %v657_v0  ;;  %v1146_v0 = vrot.slane %v4112_v19, 1 }
 0x12f   : > { %1255 = vrot.lane.b32.xlu0 %v1218_v11, %s5365_s21  ;;  %3059 = vmatprep.subr.mxu1 %v1747_v36  ;;  %v1143_v11 = vrot.slane %v941_v5, 1  ;;  %v4061_v14 = vsel %vm1119_vm3, %v1140_v13, %v1141_v8  ;;  %v4078_v32 = vsel %vm1208_vm4, %v1229_v30, %v1230_v25  ;;  %5371 = vst [vmem:[#allocation29_spill] sm:$0xff] %v4084_v33  ;;  %v1135_v51 = vrot.slane %v4084_v33, 1 }
 0x130   : > { %3064 = vmatpush3.msra.mxu1 %v1747_v36  ;;  %v4095_v41 = vsel %vm1208_vm4, %v1230_v25, %v1232_v38  ;;  %v4110_v16 = vpop.permute.xlu0 %455  ;;  %v1145_v1 = vrot.slane %v4103_v61, 1  ;;  %v1224_v5 = vrot.slane %v4084_v33, 2 }
 0x131   : > { %v4066_v17 = vsel %vm1119_vm3, %v1141_v8, %v1143_v11  ;;  %v942_v11 = vcombine.high %v4036_v23, %v4029_v44  ;;  %v1235_v44 = vrot.slane %v4112_v19, 2  ;;  %v1234_v23 = vrot.slane %v4103_v61, 2 }
 0x132   : > { %1253 = vrot.lane.b32.xlu1 %v1216_v29, %s5365_s21  ;;  %v4073_v29 = vpop.permute.xlu1 %413  ;;  %v4132_v54 = vsel %vm1119_vm3, %v1145_v1, %v1146_v0 }
 0x133   : > { %1512 = vrot.lane.b32.xlu0 %v1134_v48, %s5294_s8  ;;  %v1148_v25 = vrot.slane %v942_v11, 1 }
 0x134   : > { %v4122_v24 = vpop.permute.xlu0 %467 }
 0x135   : > { %v4160_v38 = vsel %vm1119_vm3, %v1146_v0, %v1148_v25 }
 0x136   : > { %1510 = vrot.lane.b32.xlu1 %v1132_v42, %s5294_s8  ;;  %v4088_v36 = vpop.permute.xlu1 %425 }
 0x137   : > { %1168 = vrot.lane.b32.xlu0 %v1132_v42, %s5292_s11 }
 0x138   : > { %v4138_v63 = vpop.permute.xlu0 %479 }
 0x13a   : > { %1357 = vrot.lane.b32.xlu1 %v1132_v42, %s5367_s3  ;;  %v4101_v50 = vpop.permute.xlu1 %437 }
 0x13b   : > { %1359 = vrot.lane.b32.xlu0 %v1134_v48, %s5367_s3 }
 0x13c   : > { %v4151_v30 = vpop.permute.xlu0 %491 }
 0x13e   : > { %1563 = vrot.lane.b32.xlu1 %v1221_v57, %s5290_s12  ;;  %v4114_v15 = vpop.permute.xlu1 %449 }
 0x13f   : > { %1565 = vrot.lane.b32.xlu0 %v1223_v2, %s5290_s12  ;;  %s5372_s12 = smov 24  }
 0x142   : > { %1176 = vrot.lane.b32.xlu1 %v4061_v14, %s5292_s11  ;;  %v4126_v20 = vpop.permute.xlu1 %461 }
 0x143   : > { %1178 = vrot.lane.b32.xlu0 %v4066_v17, %s5292_s11 }
 0x146   : > { %1410 = vrot.lane.b32.xlu1 %v1221_v57, %s5370_s17  ;;  %v4142_v8 = vpop.permute.xlu1 %473 }
 0x147   : > { %1265 = vrot.lane.b32.xlu0 %v4078_v32, %s5365_s21 }
 0x14a   : > { %1170 = vrot.lane.b32.xlu1 %v1134_v48, %s5292_s11  ;;  %v1136_v48 = vrot.slane %v3870_v46, 1  ;;  %s5373_s11 = smov 12  }
 0x14b   : > { %1460 = vrot.lane.b32.xlu0 %v4084_v33, %s5372_s12 }
 0x14c   : > { %v1137_v42 = vsel %vm1119_vm3, %v1135_v51, %v1136_v48  ;;  %v4166_v51 = vpop.permute.xlu0 %503 }
 0x14e   : > { %1257 = vrot.lane.b32.xlu1 %v1221_v57, %s5365_s21  ;;  %v940_v57 = vcombine.high %v3950_v52, %v3945_v56  ;;  %v4155_v56 = vpop.permute.xlu1 %485 }
 0x14f   : > { %1267 = vrot.lane.b32.xlu0 %v4095_v41, %s5365_s21 }
 0x150   : > { %v1138_v13 = vrot.slane %v940_v57, 1  ;;  %v4177_v0 = vpop.permute.xlu0 %515 }
 0x152   : > { %1412 = vrot.lane.b32.xlu1 %v1223_v2, %s5370_s17  ;;  %v1139_v52 = vsel %vm1119_vm3, %v1136_v48, %v1138_v13  ;;  %v4168_v1 = vpop.permute.xlu1 %497  ;;  %v4172_v48 = vsel %vm1208_vm4, %v1234_v23, %v1235_v44  ;;  %v1227_v13 = vrot.slane %v940_v57, 2 }
 0x153   : > { %1315 = vrot.lane.b32.xlu0 %v4103_v61, %s5373_s11 }
 0x154   : > { %v1228_v25 = vsel %vm1208_vm4, %v1225_v55, %v1227_v13 }
 0x156   : > { %1259 = vrot.lane.b32.xlu1 %v1223_v2, %s5365_s21  ;;  %v1226_v2 = vsel %vm1208_vm4, %v1224_v5, %v1225_v55  ;;  %v4180_v5 = vpop.permute.xlu1 %509 }
 0x157   : > { %1514 = vrot.lane.b32.xlu0 %v1137_v42, %s5294_s8  ;;  %s5374_s8 = smov 32  }
 0x15a   : > { %1307 = vrot.lane.b32.xlu1 %v4084_v33, %s5373_s11  ;;  %v4187_v23 = vpop.permute.xlu1 %521  ;;  %v1150_v33 = vrot.slane %v3830_v58, 1 }
 0x15b   : > { %1317 = vrot.lane.b32.xlu0 %v4112_v19, %s5373_s11 }
 0x15e   : > { %1462 = vrot.lane.b32.xlu1 %v3870_v46, %s5372_s12  ;;  %v4195_v57 = vpop.permute.xlu1 %533 }
 0x15f   : > { %1369 = vrot.lane.b32.xlu0 %v4132_v54, %s5367_s3 }
 0x162   : > { %1309 = vrot.lane.b32.xlu1 %v3870_v46, %s5373_s11 }
 0x163   : > { %1567 = vrot.lane.b32.xlu0 %v1226_v2, %s5374_s8 }
 0x166   : > { %1361 = vrot.lane.b32.xlu1 %v1137_v42, %s5367_s3 }
 0x167   : > { %1180 = vrot.lane.b32.xlu0 %v4132_v54, %s5375_s0 }
 0x16a   : > { %1516 = vrot.lane.b32.xlu1 %v1139_v52, %s5376_s1 }
 0x16b   : > { %1371 = vrot.lane.b32.xlu0 %v4160_v38, %s5367_s3 }
 0x16e   : > { %1172 = vrot.lane.b32.xlu1 %v1137_v42, %s5375_s0  ;;  %v4184_v42 = vpop.permute.xlu0 %527 }
 0x16f   : > { %1422 = vrot.lane.b32.xlu0 %v4172_v48, %s5370_s17 }
 0x172   : > { %1363 = vrot.lane.b32.xlu1 %v1139_v52, %s5367_s3  ;;  %v1300_v27 = vpop.permute.xlu0 %1299 }
 0x173   : > { %1174 = vrot.lane.b32.xlu0 %v1139_v52, %s5375_s0  ;;  %v1237_v52 = vrot.slane %v942_v11, 2 }
 0x175   : > { %v4205_v22 = vsel %vm1208_vm4, %v1235_v44, %v1237_v52 }
 0x176   : > { %1414 = vrot.lane.b32.xlu1 %v1226_v2, %s5370_s17 }
 0x177   : > { %1261 = vrot.lane.b32.xlu0 %v1226_v2, %s5365_s21 }
 0x17a   : > { %1569 = vrot.lane.b32.xlu1 %v1228_v25, %s5374_s8 }
 0x17b   : > { %1416 = vrot.lane.b32.xlu0 %v1228_v25, %s5370_s17 }
 0x17e   : > { %1182 = vrot.lane.b32.xlu1 %v4160_v38, %s5375_s0 }
 0x17f   : > { %1464 = vrot.lane.b32.xlu0 %v4046_v3, %s5372_s12 }
 0x181   : > { %v4197_v2 = vpop.permute.xlu0 %1458 }
 0x182   : > { %1269 = vrot.lane.b32.xlu1 %v4172_v48, %s5365_s21  ;;  %v1302_v55 = vpop.permute.xlu1 %1301 }
 0x183   : > { %1263 = vrot.lane.b32.xlu0 %v1228_v25, %s5365_s21 }
 0x185   : > { %v4202_v13 = vpop.permute.xlu0 %1305 }
 0x186   : > { %5377 = vst [vmem:[#allocation30_spill] sm:$0xff] %v4202_v13  ;;  %1424 = vrot.lane.b32.xlu1 %v4205_v22, %s5370_s17  ;;  %v1457_v7 = vpop.permute.xlu1 %1456  ;;  %v1152_v13 = vsel %vm1119_vm3, %v1150_v33, %v5379_v4 }
 0x187   : > { %1311 = vrot.lane.b32.xlu0 %v4046_v3, %s5373_s11 }
 0x189   : > { %v1161_v12 = vpop.permute.xlu0 %1160 }
 0x18a   : > { %1472 = vrot.lane.b32.xlu1 %v3830_v58, %s5372_s12  ;;  %v4219_v44 = vpop.permute.xlu1 %1303  ;;  %v1612_v34 = vsel %vm1611_vm6, %v3893_v60, %v1161_v12  ;;  %v5381_v60 = vrot.slane %v3873_v43, 2 }
 0x18b   : > { %1466 = vrot.lane.b32.xlu0 %v4039_v53, %s5372_s12 }
 0x18d   : > { %v1250_v11 = vpop.permute.xlu0 %1249 }
 0x18e   : > { %1271 = vrot.lane.b32.xlu1 %v4205_v22, %s5365_s21 }
 0x18f   : > { %1518 = vrot.lane.b32.xlu0 %v4061_v14, %s5376_s1 }
 0x191   : > { %v1354_v25 = vpop.permute.xlu0 %1353 }
 0x192   : > { %1319 = vrot.lane.b32.xlu1 %v3830_v58, %s5373_s11 }
 0x193   : > { %1313 = vrot.lane.b32.xlu0 %v4039_v53, %s5373_s11 }
 0x194   : > { %v1163_v52 = vpop.permute.xlu1 %1162 }
 0x195   : > { %v1356_v46 = vpop.permute.xlu0 %1355  ;;  %v1613_v33 = vsel %vm1611_vm6, %v3884_v40, %v1163_v52 }
 0x196   : > { %1474 = vrot.lane.b32.xlu1 %v3873_v43, %s5372_s12 }
 0x197   : > { %1365 = vrot.lane.b32.xlu0 %v4061_v14, %s5367_s3 }
 0x198   : > { %v1252_v39 = vpop.permute.xlu1 %1251 }
 0x199   : > { %v4230_v3 = vpop.permute.xlu0 %1166  ;;  %v1630_v18 = vsel %vm1628_vm7, %v1613_v33, %v1252_v39 }
 0x19a   : > { %5378 = vst [vmem:[#allocation31_spill] sm:$0xff] %v4230_v3  ;;  %1526 = vrot.lane.b32.xlu1 %v1152_v13, %s5376_s1  ;;  %v1647_v40 = vsel %vm1645_vm8, %v1630_v18, %v1302_v55 }
 0x19b   : > { %1520 = vrot.lane.b32.xlu0 %v4066_v17, %s5376_s1 }
 0x19c   : > { %v4238_v53 = vpop.permute.xlu1 %1164 }
 0x19d   : > { %v1409_v45 = vpop.permute.xlu0 %1408 }
 0x19e   : > { %1321 = vrot.lane.b32.xlu1 %v3873_v43, %s5373_s11 }
 0x19f   : > { %1571 = vrot.lane.b32.xlu0 %v4078_v32, %s5374_s8 }
 0x1a0   : > { %v1407_v14 = vpop.permute.xlu1 %1406 }
 0x1a1   : > { %v4244_v37 = vpop.permute.xlu0 %1255 }
 0x1a2   : > { %5380 = vst [vmem:[#allocation32_spill] sm:$0xff] %v4244_v37  ;;  %1373 = vrot.lane.b32.xlu1 %v1152_v13, %s5367_s3  ;;  %v1629_v37 = vsel %vm1628_vm7, %v1612_v34, %v1250_v11  ;;  %v1664_v11 = vsel %vm1662_vm9, %v1647_v40, %v1356_v46 }
 0x1a3   : > { %1184 = vrot.lane.b32.xlu0 %v1152_v13, %s5375_s0  ;;  %v1239_v13 = vrot.slane %v3830_v58, 2  ;;  %v1646_v12 = vsel %vm1645_vm8, %v1629_v37, %v1300_v27  ;;  %v1681_v55 = vsel %vm1679_vm10, %v1664_v11, %v1409_v45 }
 0x1a4   : > { %v4248_v4 = vpop.permute.xlu1 %1253  ;;  %v1663_v34 = vsel %vm1662_vm9, %v1646_v12, %v1354_v25  ;;  %v1698_v46 = vsel %vm1696_vm11, %v1681_v55, %v4197_v2  ;;  %v1155_v12 = vrot.slane %v3832_v59, 1 }
 0x1a5   : > { %v1513_v3 = vpop.permute.xlu0 %1512  ;;  %v1241_v39 = vsel %vm1208_vm4, %v1239_v13, %v5381_v60  ;;  %v1680_v33 = vsel %vm1679_vm10, %v1663_v34, %v1407_v14 }
 0x1a6   : > { %1528 = vrot.lane.b32.xlu1 %v3973_v21, %s5376_s1  ;;  %v1697_v37 = vsel %vm1696_vm11, %v1680_v33, %v1457_v7  ;;  %v1715_v25 = vsel %vm1713_vm12, %v1698_v46, %v1513_v3 }
 0x1a7   : > { %1375 = vrot.lane.b32.xlu0 %v3973_v21, %s5367_s3 }
 0x1a8   : > { %v1511_v28 = vpop.permute.xlu1 %1510 }
 0x1a9   : > { %v4262_v52 = vpop.permute.xlu0 %1168  ;;  %v1714_v27 = vsel %vm1713_vm12, %v1697_v37, %v1511_v28 }
 0x1aa   : > { %1579 = vrot.lane.b32.xlu1 %v1241_v39, %s5374_s8 }
 0x1ab   : > { %1426 = vrot.lane.b32.xlu0 %v1241_v39, %s5370_s17 }
 0x1ac   : > { %v1358_v18 = vpop.permute.xlu1 %1357 }
 0x1ad   : > { %v4274_v43 = vpop.permute.xlu0 %1359 }
 0x1ae   : > { %1367 = vrot.lane.b32.xlu1 %v4066_v17, %s5367_s3 }
 0x1af   : > { %1581 = vrot.lane.b32.xlu0 %v3981_v26, %s5374_s8 }
 0x1b0   : > { %v1564_v45 = vpop.permute.xlu1 %1563 }
 0x1b1   : > { %v1566_v14 = vpop.permute.xlu0 %1565  ;;  %v1731_v13 = vsel %vm1730_vm13, %v1714_v27, %v1564_v45 }
 0x1b2   : > { %v1732_v17 = vsel %vm1730_vm13, %v1715_v25, %v1566_v14  ;;  %1418 = vrot.lane.b32.xlu1 %v4078_v32, %s5370_s17  ;;  %3031 = vmatprep.mubr.msk.f32.mxu0 %vm1752_vm14, %v1731_v13  ;;  %v1244_v25 = vrot.slane %v3832_v59, 2 }
 0x1b3   : > { %1273 = vrot.lane.b32.xlu0 %v1241_v39, %s5365_s21  ;;  %3032 = vmatmul.mubr.msk.f32.vlgmr.msra.gmra.mxu0 %vm1752_vm14, %v1732_v17 }
 0x1b4   : > { %v4292_v7 = vpop.permute.xlu1 %1176 }
 0x1b5   : > { %v4294_v28 = vpop.permute.xlu0 %1178 }
 0x1b6   : > { %1573 = vrot.lane.b32.xlu1 %v4095_v41, %s5374_s8 }
 0x1b7   : > { %1428 = vrot.lane.b32.xlu0 %v3981_v26, %s5370_s17 }
 0x1b8   : > { %v1411_v3 = vpop.permute.xlu1 %1410 }
 0x1b9   : > { %v4300_v2 = vpop.permute.xlu0 %1265 }
 0x1ba   : > { %1186 = vrot.lane.b32.xlu1 %v3973_v21, %s5375_s0 }
 0x1bb   : > { %1476 = vrot.lane.b32.xlu0 %v3832_v59, %s5372_s12 }
 0x1bc   : > { %v4306_v32 = vpop.permute.xlu1 %1170 }
 0x1bd   : > { %v1461_v40 = vpop.permute.xlu0 %1460 }
 0x1be   : > { %1420 = vrot.lane.b32.xlu1 %v4095_v41, %s5370_s17  ;;  %v5382_v41 = vrot.slane %v3875_v47, 1 }
 0x1bf   : > { %1323 = vrot.lane.b32.xlu0 %v3832_v59, %s5373_s11 }
 0x1c0   : > { %v4312_v60 = vpop.permute.xlu1 %1257  ;;  %v1157_v11 = vsel %vm1119_vm3, %v1155_v12, %v5382_v41 }
 0x1c1   : > { %v4314_v39 = vpop.permute.xlu0 %1267 }
 0x1c2   : > { %1468 = vrot.lane.b32.xlu1 %v4103_v61, %s5372_s12 }
 0x1c3   : > { %1478 = vrot.lane.b32.xlu0 %v3875_v47, %s5372_s12 }
 0x1c4   : > { %v4320_v21 = vpop.permute.xlu1 %1412 }
 0x1c5   : > { %v4323_v34 = vpop.permute.xlu0 %1315 }
 0x1c6   : > { %1275 = vrot.lane.b32.xlu1 %v3981_v26, %s5365_s21  ;;  %v1614_v26 = vsel %vm1611_vm6, %v3835_v62, %v4238_v53  ;;  %v5383_v53 = vrot.slane %v3875_v47, 2 }
 0x1c7   : > { %1530 = vrot.lane.b32.xlu0 %v1157_v11, %s5376_s1  ;;  %v1631_v27 = vsel %vm1628_vm7, %v1614_v26, %v4248_v4  ;;  %v995_v26 = vcombine.low %v4097_v49, %v4110_v16  ;;  %v1061_v49 = vcombine.low %v4177_v0, %v4184_v42  ;;  %v953_v16 = vcombine.low %v4054_v9, %v4073_v29 }
 0x1c8   : > { %v4331_v33 = vpop.permute.xlu1 %1259  ;;  %v1648_v14 = vsel %vm1645_vm8, %v1631_v27, %v4219_v44  ;;  %v1011_v27 = vcombine.low %v4122_v24, %v4138_v63  ;;  %v945_v24 = vcombine.low %v3740_v10, %v4051_v6  ;;  %v5384_v63 = vld [vmem:[#allocation28_spill] sm:$0xff] }
 0x1c9   : > { %v1515_v55 = vpop.permute.xlu0 %1514  ;;  %v1665_v62 = vsel %vm1662_vm9, %v1648_v14, %v1358_v18  ;;  %v1045_v14 = vcombine.low %v4151_v30, %v4166_v51 }
 0x1ca   : > { %1470 = vrot.lane.b32.xlu1 %v4112_v19, %s5372_s12  ;;  %v1682_v4 = vsel %vm1679_vm10, %v1665_v62, %v1411_v3 }
 0x1cb   : > { %1377 = vrot.lane.b32.xlu0 %v1157_v11, %s5367_s3  ;;  %v1699_v17 = vsel %vm1696_vm11, %v1682_v4, %v1461_v40  ;;  %v1003_v40 = vcombine.low %v4114_v15, %v4126_v20  ;;  %v1069_v15 = vcombine.low %v4187_v23, %v4195_v57  ;;  %v969_v20 = vcombine.low %v4088_v36, %v4101_v50 }
 0x1cc   : > { %v4336_v37 = vpop.permute.xlu1 %1307  ;;  %v1716_v12 = vsel %vm1713_vm12, %v1699_v17, %v1515_v55  ;;  %v1019_v55 = vcombine.low %v4142_v8, %v4155_v56  ;;  %v961_v8 = vcombine.low %v5384_v63, %v4086_v35  ;;  %v5385_v56 = vld [vmem:[#allocation18_spill] sm:$0xff] }
 0x1cd   : > { %v4341_v46 = vpop.permute.xlu0 %1317  ;;  %v1010_v51 = vrot.slane %v1003_v40, %v5385_v56  ;;  %v1052_v10 = vrot.slane %v1045_v14, %v5385_v56  ;;  %v1076_v6 = vrot.slane %v1069_v15, %v5385_v56  ;;  %v1068_v29 = vrot.slane %v1061_v49, %v5385_v56  ;;  %v5391_v63 = vld [vmem:[#allocation30_spill] sm:$0xff] }
 0x1ce   : > { %1522 = vrot.lane.b32.xlu1 %v4132_v54, %s5376_s1  ;;  %v4362_v54 = vsel %vm1208_vm4, %v1244_v25, %v5383_v53  ;;  %v1053_v25 = vcombine.low %v4168_v1, %v4180_v5  ;;  %v1002_v1 = vrot.slane %v995_v26, %v5385_v56  ;;  %v960_v35 = vrot.slane %v953_v16, %v5385_v56  ;;  %v5389_v26 = vld [vmem:[#allocation19_spill] sm:$0xff] }
 0x1cf   : > { %1532 = vrot.lane.b32.xlu0 %v3992_v31, %s5376_s1  ;;  %v952_v36 = vrot.slane %v945_v24, %v5385_v56  ;;  %v976_v50 = vrot.slane %v969_v20, %v5385_v56  ;;  %v968_v5 = vrot.slane %v961_v8, %v5385_v56  ;;  %v1085_v4 = vcombine.low %v1068_v29, %v1076_v6 }
 0x1d0   : > { %v4349_v45 = vpop.permute.xlu1 %1462  ;;  %v1060_v9 = vrot.slane %v1053_v25, %v5385_v56  ;;  %v1027_v23 = vcombine.low %v1002_v1, %v1010_v51  ;;  %v5390_v25 = vld [vmem:[#allocation32_spill] sm:$0xff] }
 0x1d1   : > { %v4354_v13 = vpop.permute.xlu0 %1369  ;;  %v985_v17 = vcombine.low %v968_v5, %v976_v50  ;;  %v1092_v16 = vrot.slane %v1085_v4, %v5389_v26 }
 0x1d2   : > { %1325 = vrot.lane.b32.xlu1 %v3875_v47, %s5373_s11  ;;  %v1077_v53 = vcombine.low %v1052_v10, %v1060_v9 }
 0x1d3   : > { %1583 = vrot.lane.b32.xlu0 %v4362_v54, %s5374_s8  ;;  %v992_v20 = vrot.slane %v985_v17, %v5389_v26 }
 0x1d4   : > { %v4368_v44 = vpop.permute.xlu1 %1309  ;;  %v1084_v49 = vrot.slane %v1077_v53, %v5389_v26 }
 0x1d5   : > { %v1568_v18 = vpop.permute.xlu0 %1567 }
 0x1d6   : > { %v1733_v41 = vsel %vm1730_vm13, %v1716_v12, %v1568_v18  ;;  %1524 = vrot.lane.b32.xlu1 %v4160_v38, %s5376_s1  ;;  %v5387_v12 = vld [vmem:[#allocation31_spill] sm:$0xff]  ;;  %v1093_v9 = vcombine.low %v1084_v49, %v1092_v16 }
 0x1d7   : > { %1379 = vrot.lane.b32.xlu0 %v3992_v31, %s5367_s3  ;;  %3034 = vmatprep.mubr.msk.f32.mxu0 %vm1752_vm14, %v1733_v41  ;;  %v5388_v18 = vld [vmem:[#allocation23_spill] sm:$0xff] }
 0x1d8   : > { %v4377_v3 = vpop.permute.xlu1 %1361  ;;  %v1615_v41 = vsel %vm1611_vm6, %v5388_v18, %v5387_v12 }
 0x1d9   : > { %v4387_v38 = vpop.permute.xlu0 %1180  ;;  %v1632_v14 = vsel %vm1628_vm7, %v1615_v41, %v5390_v25 }
 0x1da   : > { %1575 = vrot.lane.b32.xlu1 %v4172_v48, %s5374_s8  ;;  %v1026_v48 = vrot.slane %v1019_v55, %v5385_v56  ;;  %v1034_v55 = vrot.slane %v1027_v23, %v5389_v26  ;;  %v1649_v8 = vsel %vm1645_vm8, %v1632_v14, %v5391_v63 }
 0x1db   : > { %1577 = vrot.lane.b32.xlu0 %v4205_v22, %s5374_s8  ;;  %v1018_v22 = vrot.slane %v1011_v27, %v5385_v56  ;;  %v1666_v1 = vsel %vm1662_vm9, %v1649_v8, %v4274_v43 }
 0x1dc   : > { %v1517_v30 = vpop.permute.xlu1 %1516  ;;  %v1683_v10 = vsel %vm1679_vm10, %v1666_v1, %v4320_v21  ;;  %v1351_v21 = vrot.slane %v1093_v9, 1 }
 0x1dd   : > { %v4413_v0 = vpop.permute.xlu0 %1371  ;;  %v1035_v57 = vcombine.low %v1018_v22, %v1026_v48  ;;  %v1700_v6 = vsel %vm1696_vm11, %v1683_v10, %v4349_v45 }
 0x1de   : > { %1188 = vrot.lane.b32.xlu1 %v1157_v11, %s5375_s0  ;;  %v977_v11 = vcombine.low %v952_v36, %v960_v35  ;;  %v1717_v29 = vsel %vm1713_vm12, %v1700_v6, %v1517_v30 }
 0x1df   : > { %1190 = vrot.lane.b32.xlu0 %v3992_v31, %s5375_s0  ;;  %v5386_v31 = vld [vmem:[#allocation25_spill] sm:$0xff]  ;;  %v1042_v27 = vrot.slane %v1035_v57, %v5389_v26  ;;  %s5408_s0 = smov 56  }
 0x1e0   : > { %v4426_v42 = vpop.permute.xlu1 %1172  ;;  %v984_v24 = vrot.slane %v977_v11, %v5389_v26 }
 0x1e1   : > { %v4428_v62 = vpop.permute.xlu0 %1422  ;;  %v1043_v22 = vcombine.low %v1034_v55, %v1042_v27  ;;  %v1044_v41 = vcombine.high %v1034_v55, %v1042_v27 }
 0x1e2   : > { %1430 = vrot.lane.b32.xlu1 %v4362_v54, %s5370_s17  ;;  %v993_v36 = vcombine.low %v984_v24, %v992_v20  ;;  %v994_v14 = vcombine.high %v984_v24, %v992_v20 }
 0x1e3   : > { %1432 = vrot.lane.b32.xlu0 %v5386_v31, %s5370_s17  ;;  %v1349_v5 = vrot.slane %v1043_v22, 1  ;;  %v1402_v17 = vrot.slane %v1043_v22, 2  ;;  %v1559_v20 = vrot.slane %v1044_v41, 2 }
 0x1e4   : > { %v4437_v40 = vpop.permute.xlu1 %1363  ;;  %v1348_v23 = vrot.slane %v993_v36, 1  ;;  %v1401_v18 = vrot.slane %v993_v36, 2  ;;  %v1558_v24 = vrot.slane %v994_v14, 2 }
 0x1e5   : > { %v4443_v15 = vpop.permute.xlu0 %1174  ;;  %v1352_v30 = vsel %vm1119_vm3, %v1349_v5, %v1351_v21 }
 0x1e6   : > { %1585 = vrot.lane.b32.xlu1 %v5386_v31, %s5374_s8  ;;  %v1350_v4 = vsel %vm1119_vm3, %v1348_v23, %v1349_v5  ;;  %v1403_v1 = vsel %vm1208_vm4, %v1401_v18, %v1402_v17  ;;  %v5392_v23 = vld [vmem:[#allocation24_spill] sm:$0xff] }
 0x1e7   : > { %1279 = vrot.lane.b32.xlu0 %v5386_v31, %s5365_s21  ;;  %v1404_v31 = vrot.slane %v1093_v9, 2  ;;  %v1505_v9 = vrot.slane %v994_v14, 1 }
 0x1e8   : > { %v4455_v51 = vpop.permute.xlu1 %1414 }
 0x1e9   : > { %v4459_v48 = vpop.permute.xlu0 %1261  ;;  %v1405_v25 = vsel %vm1208_vm4, %v1402_v17, %v1404_v31 }
 0x1ea   : > { %1277 = vrot.lane.b32.xlu1 %v4362_v54, %s5365_s21 }
 0x1eb   : > { %1482 = vrot.lane.b32.xlu0 %v1043_v22, %s5372_s12 }
 0x1ec   : > { %v1570_v35 = vpop.permute.xlu1 %1569 }
 0x1ed   : > { %v1734_v43 = vsel %vm1730_vm13, %v1717_v29, %v1570_v35  ;;  %v4470_v50 = vpop.permute.xlu0 %1416  ;;  %v1094_v29 = vcombine.high %v1084_v49, %v1092_v16 }
 0x1ee   : > { %1480 = vrot.lane.b32.xlu1 %v993_v36, %s5372_s12  ;;  %3035 = vmatmul.mubr.msk.f32.gmra.mxu0 %vm1752_vm14, %v1734_v43 }
 0x1ef   : > { %1329 = vrot.lane.b32.xlu0 %v1043_v22, %s5373_s11  ;;  %v1506_v22 = vrot.slane %v1044_v41, 1  ;;  %v1508_v5 = vrot.slane %v1094_v29, 1  ;;  %v1561_v18 = vrot.slane %v1094_v29, 2 }
 0x1f0   : > { %v1183_v54 = vpop.permute.xlu1 %1182 }
 0x1f1   : > { %v1465_v45 = vpop.permute.xlu0 %1464  ;;  %v1507_v27 = vsel %vm1119_vm3, %v1505_v9, %v1506_v22  ;;  %v1509_v17 = vsel %vm1119_vm3, %v1506_v22, %v1508_v5  ;;  %v5394_v5 = vld [vmem:[#allocation26_spill] sm:$0xff]  ;;  %vm2723_vm3 = vcmask 588800  }
 0x1f2   : > { %1327 = vrot.lane.b32.xlu1 %v993_v36, %s5373_s11  ;;  %v1560_v36 = vsel %vm1208_vm4, %v1558_v24, %v1559_v20 }
 0x1f3   : > { %1536 = vrot.lane.b32.xlu0 %v1352_v30, %s5376_s1 }
 0x1f4   : > { %v4478_v57 = vpop.permute.xlu1 %1269 }
 0x1f5   : > { %v4480_v53 = vpop.permute.xlu0 %1263 }
 0x1f6   : > { %1534 = vrot.lane.b32.xlu1 %v1350_v4, %s5376_s1 }
 0x1f7   : > { %1383 = vrot.lane.b32.xlu0 %v1352_v30, %s5367_s3  ;;  %v1616_v30 = vsel %vm1611_vm6, %v5392_v23, %v4262_v52  ;;  %v1623_v52 = vsel %vm1611_vm6, %v4112_v19, %v1183_v54  ;;  %v5393_v54 = vld [vmem:[#allocation27_spill] sm:$0xff]  ;;  %v1621_v23 = vsel %vm1611_vm6, %v5394_v5, %v4294_v28 }
 0x1f8   : > { %v4485_v11 = vpop.permute.xlu1 %1424  ;;  %v1633_v49 = vsel %vm1628_vm7, %v1616_v30, %v4312_v60 }
 0x1f9   : > { %v4487_v12 = vpop.permute.xlu0 %1311 }
 0x1fa   : > { %1381 = vrot.lane.b32.xlu1 %v1350_v4, %s5367_s3  ;;  %v1650_v4 = vsel %vm1645_vm8, %v1633_v49, %v4336_v37 }
 0x1fb   : > { %1589 = vrot.lane.b32.xlu0 %v1405_v25, %s5374_s8 }
 0x1fc   : > { %v1473_v63 = vpop.permute.xlu1 %1472 }
 0x1fd   : > { %v4492_v8 = vpop.permute.xlu0 %1466 }
 0x1fe   : > { %1587 = vrot.lane.b32.xlu1 %v1403_v1, %s5374_s8 }
 0x1ff   : > { %1484 = vrot.lane.b32.xlu0 %v994_v14, %s5372_s12 }
 0x200   : > { %v1272_v10 = vpop.permute.xlu1 %1271 }
 0x201   : > { %v1519_v55 = vpop.permute.xlu0 %1518  ;;  %v1640_v14 = vsel %vm1628_vm7, %v1623_v52, %v1272_v10 }
 0x202   : > { %1434 = vrot.lane.b32.xlu1 %v1403_v1, %s5370_s17 }
 0x203   : > { %1538 = vrot.lane.b32.xlu0 %v1507_v27, %s5376_s1 }
 0x204   : > { %v4500_v6 = vpop.permute.xlu1 %1319 }
 0x205   : > { %v4502_v35 = vpop.permute.xlu0 %1313 }
 0x206   : > { %1436 = vrot.lane.b32.xlu1 %v1405_v25, %s5370_s17  ;;  %v1667_v25 = vsel %vm1662_vm9, %v1650_v4, %v4377_v3  ;;  %v1562_v3 = vsel %vm1208_vm4, %v1559_v20, %v1561_v18  ;;  %v5395_v18 = vld [vmem:[#allocation20_spill] sm:$0xff]  ;;  %vm2725_vm4 = vcmask 654336  }
 0x207   : > { %1591 = vrot.lane.b32.xlu0 %v1560_v36, %s5374_s8 }
 0x208   : > { %v1475_v43 = vpop.permute.xlu1 %1474 }
 0x209   : > { %v4507_v21 = vpop.permute.xlu0 %1365 }
 0x20a   : > { %1486 = vrot.lane.b32.xlu1 %v1044_v41, %s5372_s12  ;;  %v1684_v41 = vsel %vm1679_vm10, %v1667_v25, %v4455_v51 }
 0x20b   : > { %v1701_v60 = vsel %vm1696_vm11, %v1684_v41, %v1465_v45  ;;  %v1620_v45 = vsel %vm1611_vm6, %v5393_v54, %v4292_v7 }
 0x20c   : > { %v1527_v16 = vpop.permute.xlu1 %1526  ;;  %v1718_v1 = vsel %vm1713_vm12, %v1701_v60, %v1519_v55  ;;  %v1637_v10 = vsel %vm1628_vm7, %v1620_v45, %v4300_v2  ;;  %v1638_v2 = vsel %vm1628_vm7, %v1621_v23, %v4314_v39 }
 0x20d   : > { %v1521_v31 = vpop.permute.xlu0 %1520  ;;  %v1654_v55 = vsel %vm1645_vm8, %v1637_v10, %v4323_v34 }
 0x20e   : > { %1540 = vrot.lane.b32.xlu1 %v1509_v17, %s5376_s1  ;;  %v1671_v20 = vsel %vm1662_vm9, %v1654_v55, %v4354_v13  ;;  %v1655_v13 = vsel %vm1645_vm8, %v1638_v2, %v4341_v46  ;;  %v1617_v46 = vsel %vm1611_vm6, %v5395_v18, %v4306_v32  ;;  %s5409_s1 = smov 112  }
 0x20f   : > { %v1688_v36 = vsel %vm1679_vm10, %v1671_v20, %v4428_v62  ;;  %v1672_v62 = vsel %vm1662_vm9, %v1655_v13, %v4413_v0  ;;  %v1634_v0 = vsel %vm1628_vm7, %v1617_v46, %v4331_v33  ;;  %v5397_v13 = vld [vmem:[#allocation21_spill] sm:$0xff] }
 0x210   : > { %v1322_v37 = vpop.permute.xlu1 %1321  ;;  %v1705_v7 = vsel %vm1696_vm11, %v1688_v36, %v1473_v63  ;;  %v1689_v28 = vsel %vm1679_vm10, %v1672_v62, %v4485_v11  ;;  %v1651_v11 = vsel %vm1645_vm8, %v1634_v0, %v4368_v44 }
 0x211   : > { %v4529_v9 = vsel %vm1645_vm8, %v1640_v14, %v1322_v37  ;;  %v1572_v22 = vpop.permute.xlu0 %1571  ;;  %v1722_v34 = vsel %vm1713_vm12, %v1705_v7, %v1527_v16  ;;  %v1706_v63 = vsel %vm1696_vm11, %v1689_v28, %v1475_v43  ;;  %v1668_v43 = vsel %vm1662_vm9, %v1651_v11, %v4437_v40 }
 0x212   : > { %v1735_v27 = vsel %vm1730_vm13, %v1718_v1, %v1572_v22  ;;  %1593 = vrot.lane.b32.xlu1 %v1562_v3, %s5374_s8  ;;  %v1685_v32 = vsel %vm1679_vm10, %v1668_v43, %v4470_v50 }
 0x213   : > { %3037 = vmatprep.mubr.msk.f32.mxu0 %vm1752_vm14, %v1735_v27  ;;  %v1702_v33 = vsel %vm1696_vm11, %v1685_v32, %v4492_v8 }
 0x214   : > { %v1374_v19 = vpop.permute.xlu1 %1373  ;;  %v1719_v37 = vsel %vm1713_vm12, %v1702_v33, %v1521_v31  ;;  %v1622_v31 = vsel %vm1611_vm6, %v4103_v61, %v4387_v38  ;;  %v5396_v61 = vld [vmem:[#allocation29_spill] sm:$0xff] }
 0x215   : > { %v1185_v51 = vpop.permute.xlu0 %1184  ;;  %v1639_v55 = vsel %vm1628_vm7, %v1622_v31, %v4478_v57  ;;  %v1618_v38 = vsel %vm1611_vm6, %v5396_v61, %v4426_v42 }
 0x216   : > { %v1624_v52 = vsel %vm1611_vm6, %v3830_v58, %v1185_v51  ;;  %v1656_v20 = vsel %vm1645_vm8, %v1639_v55, %v4500_v6  ;;  %v1619_v6 = vsel %vm1611_vm6, %v5397_v13, %v4443_v15 }
 0x217   : > { %v1673_v5 = vsel %vm1662_vm9, %v1656_v20, %v1374_v19  ;;  %v1635_v19 = vsel %vm1628_vm7, %v1618_v38, %v4459_v48 }
 0x218   : > { %v1529_v24 = vpop.permute.xlu1 %1528 }
 0x219   : > { %v4544_v29 = vpop.permute.xlu0 %1375  ;;  %v1723_v16 = vsel %vm1713_vm12, %v1706_v63, %v1529_v24 }
 0x21c   : > { %v1580_v30 = vpop.permute.xlu1 %1579 }
 0x21d   : > { %v1427_v49 = vpop.permute.xlu0 %1426  ;;  %v1739_v4 = vsel %vm1730_vm13, %v1722_v34, %v1580_v30 }
 0x21e   : > { %3043 = vmatprep.mubr.msk.f32.mxu1 %vm1752_vm14, %v1739_v4  ;;  %v1690_v23 = vsel %vm1679_vm10, %v1673_v5, %v1427_v49  ;;  %v1636_v49 = vsel %vm1628_vm7, %v1619_v6, %v4480_v53  ;;  %v1652_v4 = vsel %vm1645_vm8, %v1635_v19, %v4487_v12 }
 0x21f   : > { %v1653_v42 = vsel %vm1645_vm8, %v1636_v49, %v4502_v35  ;;  %v1669_v28 = vsel %vm1662_vm9, %v1652_v4, %v4507_v21 }
 0x220   : > { %v1368_v39 = vpop.permute.xlu1 %1367 }
 0x221   : > { %v1582_v17 = vpop.permute.xlu0 %1581  ;;  %v1670_v15 = vsel %vm1662_vm9, %v1653_v42, %v1368_v39 }
 0x222   : > { %v1740_v25 = vsel %vm1730_vm13, %v1723_v16, %v1582_v17 }
 0x223   : > { %3044 = vmatmul.mubr.msk.f32.vlgmr.msra.gmra.mxu1 %vm1752_vm14, %v1740_v25 }
 0x224   : > { %v1419_v41 = vpop.permute.xlu1 %1418 }
 0x225   : > { %v1274_v60 = vpop.permute.xlu0 %1273  ;;  %v1686_v48 = vsel %vm1679_vm10, %v1669_v28, %v1419_v41  ;;  %v1674_v41 = vsel %vm1662_vm9, %v4529_v9, %v4544_v29 }
 0x226   : > { %v4581_v14 = vsel %vm1628_vm7, %v1624_v52, %v1274_v60 }
 0x228   : > { %v1574_v44 = vpop.permute.xlu1 %1573 }
 0x229   : > { %v1736_v1 = vsel %vm1730_vm13, %v1719_v37, %v1574_v44  ;;  %v1429_v22 = vpop.permute.xlu0 %1428 }
 0x22a   : > { %3038 = vmatmul.mubr.msk.f32.gmra.mxu0 %vm1752_vm14, %v1736_v1  ;;  %v1691_v52 = vsel %vm1679_vm10, %v1674_v41, %v1429_v22  ;;  %v5398_v22 = vld [vmem:[#allocation22_spill] sm:$0xff] }
 0x22c   : > { %v4588_v40 = vpop.permute.xlu1 %1186 }
 0x22d   : > { %v1477_v58 = vpop.permute.xlu0 %1476 }
 0x22e   : > { %v1707_v7 = vsel %vm1696_vm11, %v1690_v23, %v1477_v58 }
 0x230   : > { %v1421_v3 = vpop.permute.xlu1 %1420 }
 0x231   : > { %v4590_v27 = vpop.permute.xlu0 %1323  ;;  %v1687_v16 = vsel %vm1679_vm10, %v1670_v15, %v1421_v3 }
 0x232   : > { %v1658_v31 = vsel %vm1645_vm8, %v4581_v14, %v4590_v27 }
 0x234   : > { %v1469_v50 = vpop.permute.xlu1 %1468 }
 0x235   : > { %v1479_v51 = vpop.permute.xlu0 %1478  ;;  %v1703_v17 = vsel %vm1696_vm11, %v1686_v48, %v1469_v50 }
 0x236   : > { %v1708_v60 = vsel %vm1696_vm11, %v1691_v52, %v1479_v51  ;;  %v1625_v51 = vsel %vm1611_vm6, %v5398_v22, %v4588_v40 }
 0x238   : > { %v1276_v54 = vpop.permute.xlu1 %1275 }
 0x239   : > { %v1531_v45 = vpop.permute.xlu0 %1530  ;;  %v1642_v55 = vsel %vm1628_vm7, %v1625_v51, %v1276_v54 }
 0x23a   : > { %v1724_v34 = vsel %vm1713_vm12, %v1707_v7, %v1531_v45 }
 0x23c   : > { %v1471_v10 = vpop.permute.xlu1 %1470 }
 0x23d   : > { %v1378_v8 = vpop.permute.xlu0 %1377  ;;  %v1704_v53 = vsel %vm1696_vm11, %v1687_v16, %v1471_v10 }
 0x23e   : > { %v1675_v20 = vsel %vm1662_vm9, %v1658_v31, %v1378_v8 }
 0x240   : > { %v1523_v24 = vpop.permute.xlu1 %1522 }
 0x241   : > { %v1533_v36 = vpop.permute.xlu0 %1532  ;;  %v1720_v12 = vsel %vm1713_vm12, %v1703_v17, %v1523_v24 }
 0x242   : > { %v1725_v32 = vsel %vm1713_vm12, %v1708_v60, %v1533_v36 }
 0x244   : > { %v1326_v2 = vpop.permute.xlu1 %1325 }
 0x245   : > { %v1584_v30 = vpop.permute.xlu0 %1583  ;;  %v1659_v36 = vsel %vm1645_vm8, %v1642_v55, %v1326_v2 }
 0x246   : > { %v1741_v57 = vsel %vm1730_vm13, %v1724_v34, %v1584_v30 }
 0x247   : > { %3046 = vmatprep.mubr.msk.f32.mxu1 %vm1752_vm14, %v1741_v57 }
 0x248   : > { %v1525_v62 = vpop.permute.xlu1 %1524 }
 0x249   : > { %v1380_v63 = vpop.permute.xlu0 %1379  ;;  %v1721_v46 = vsel %vm1713_vm12, %v1704_v53, %v1525_v62 }
 0x24a   : > { %v1676_v23 = vsel %vm1662_vm9, %v1659_v36, %v1380_v63 }
 0x24c   : > { %v1576_v18 = vpop.permute.xlu1 %1575 }
 0x24d   : > { %v1737_v35 = vsel %vm1730_vm13, %v1720_v12, %v1576_v18  ;;  %v1578_v25 = vpop.permute.xlu0 %1577 }
 0x24e   : > { %v1738_v21 = vsel %vm1730_vm13, %v1721_v46, %v1578_v25  ;;  %3040 = vmatprep.mubr.msk.f32.mxu0 %vm1752_vm14, %v1737_v35 }
 0x24f   : > { %3041 = vmatmul.mubr.msk.f32.gmra.mxu0 %vm1752_vm14, %v1738_v21 }
 0x250   : > { %v1189_v39 = vpop.permute.xlu1 %1188 }
 0x251   : > { %v1191_v0 = vpop.permute.xlu0 %1190  ;;  %v1626_v54 = vsel %vm1611_vm6, %v3832_v59, %v1189_v39 }
 0x252   : > { %v1627_v18 = vsel %vm1611_vm6, %v3875_v47, %v1191_v0  ;;  %vm2729_vm6 = vcmask 785408  }
 0x254   : > { %v1431_v11 = vpop.permute.xlu1 %1430 }
 0x255   : > { %v1433_v43 = vpop.permute.xlu0 %1432  ;;  %v1692_v7 = vsel %vm1679_vm10, %v1675_v20, %v1431_v11 }
 0x256   : > { %v1693_v34 = vsel %vm1679_vm10, %v1676_v23, %v1433_v43 }
 0x258   : > { %v1586_v33 = vpop.permute.xlu1 %1585 }
 0x259   : > { %v1742_v37 = vsel %vm1730_vm13, %v1725_v32, %v1586_v33  ;;  %v1280_v44 = vpop.permute.xlu0 %1279 }
 0x25a   : > { %3047 = vmatmul.mubr.msk.f32.gmra.mxu1 %vm1752_vm14, %v1742_v37  ;;  %v1644_v46 = vsel %vm1628_vm7, %v1627_v18, %v1280_v44  ;;  %v3461_v44 = vmov 0.0  }
 0x25b   : > { %v2536_v31 = vcombine.high %v3461_v44, %v3461_v44 }
 0x25c   : > { %v1278_v1 = vpop.permute.xlu1 %1277 }
 0x25d   : > { %v1483_v58 = vpop.permute.xlu0 %1482  ;;  %v1643_v38 = vsel %vm1628_vm7, %v1626_v54, %v1278_v1  ;;  %v2535_v1 = vcombine.low %v3461_v44, %v3461_v44  ;;  %v4704_v55 = vrot.slane %v2536_v31, %v5385_v56 }
 0x25e   : > { %v1710_v30 = vsel %vm1696_vm11, %v1693_v34, %v1483_v58 }
 0x25f   : > { %v2543_v58 = vrot.slane %v2535_v1, %v5385_v56 }
 0x260   : > { %v1481_v3 = vpop.permute.xlu1 %1480 }
 0x261   : > { %v1330_v50 = vpop.permute.xlu0 %1329  ;;  %v1709_v40 = vsel %vm1696_vm11, %v1692_v7, %v1481_v3  ;;  %v2551_v3 = vcombine.low %v2543_v58, %v2543_v58 }
 0x262   : > { %v1661_v35 = vsel %vm1645_vm8, %v1644_v46, %v1330_v50 }
 0x263   : > { %v2559_v50 = vrot.slane %v2551_v3, %v5389_v26 }
 0x264   : > { %v1328_v45 = vpop.permute.xlu1 %1327 }
 0x265   : > { %v1537_v10 = vpop.permute.xlu0 %1536  ;;  %v1660_v13 = vsel %vm1645_vm8, %v1643_v38, %v1328_v45  ;;  %v2552_v45 = vcombine.high %v2543_v58, %v2543_v58  ;;  %vm2731_vm8 = vcmask 850944  }
 0x266   : > { %v1727_v8 = vsel %vm1713_vm12, %v1710_v30, %v1537_v10  ;;  %v2583_v10 = vcombine.low %v2559_v50, %v2559_v50 }
 0x268   : > { %v1535_v9 = vpop.permute.xlu1 %1534  ;;  %2680 = vrot.lane.b32.xlu1 %v2583_v10, %s5353_s9 }
 0x269   : > { %v1384_v29 = vpop.permute.xlu0 %1383  ;;  %v1726_v14 = vsel %vm1713_vm12, %v1709_v40, %v1535_v9  ;;  %v2584_v9 = vcombine.high %v2559_v50, %v2559_v50 }
 0x26a   : > { %v1678_v21 = vsel %vm1662_vm9, %v1661_v35, %v1384_v29  ;;  %v2566_v29 = vrot.slane %v2552_v45, %v5389_v26 }
 0x26c   : > { %v1382_v24 = vpop.permute.xlu1 %1381  ;;  %2684 = vrot.lane.b32.xlu1 %v2584_v9, %s5352_s15  ;;  %v2585_v22 = vcombine.low %v2566_v29, %v2566_v29  ;;  %v2586_v51 = vcombine.high %v2566_v29, %v2566_v29 }
 0x26d   : > { %v1590_v5 = vpop.permute.xlu0 %1589  ;;  %v1677_v19 = vsel %vm1662_vm9, %v1660_v13, %v1382_v24  ;;  %v2567_v24 = vcombine.low %v4704_v55, %v4704_v55 }
 0x26e   : > { %v1744_v57 = vsel %vm1730_vm13, %v1727_v8, %v1590_v5 }
 0x26f   : > { %v2575_v20 = vrot.slane %v2567_v24, %v5389_v26 }
 0x270   : > { %v1588_v27 = vpop.permute.xlu1 %1587  ;;  %2688 = vrot.lane.b32.xlu1 %v2585_v22, %s5351_s7 }
 0x271   : > { %v1743_v2 = vsel %vm1730_vm13, %v1726_v14, %v1588_v27  ;;  %v1485_v61 = vpop.permute.xlu0 %1484  ;;  %v2587_v36 = vcombine.low %v2575_v20, %v2575_v20  ;;  %v2588_v5 = vcombine.high %v2575_v20, %v2575_v20 }
 0x272   : > { %3049 = vmatprep.mubr.msk.f32.mxu1 %vm1752_vm14, %v1743_v2 }
 0x273   : > { %v4663_v6 = vpop.f32.mrf.mxu0  ;;  %3050 = vmatmul.mubr.msk.f32.gmra.mxu1 %vm1752_vm14, %v1744_v57 }
 0x274   : > { %v1435_v59 = vpop.permute.xlu1 %1434  ;;  %v1951_v42 = vsel %vm1628_vm7, %v4663_v6, 0.0  ;;  %2692 = vrot.lane.b32.xlu1 %v2586_v51, %s5349_s13 }
 0x275   : > { %v1694_v49 = vsel %vm1679_vm10, %v1677_v19, %v1435_v59  ;;  %v4668_v4 = vpop.f32.mrf.mxu0  ;;  %v1539_v62 = vpop.permute.xlu0 %1538 }
 0x276   : > { %v1950_v28 = vsel %vm1628_vm7, %v4668_v4, 0.0  ;;  %v1711_v15 = vsel %vm1696_vm11, %v1694_v49, %v1485_v61  ;;  %v1987_v46 = vmul.f32 %v4668_v4, %v4668_v4  ;;  %v2063_v44 = vrot.slane %v4668_v4, 7 }
 0x277   : > { %v1952_v63 = vadd.f32 %v1951_v42, %v1950_v28  ;;  %v1728_v16 = vsel %vm1713_vm12, %v1711_v15, %v1539_v62 }
 0x278   : > { %v1437_v48 = vpop.permute.xlu1 %1436  ;;  %2696 = vrot.lane.b32.xlu1 %v2587_v36, %s5348_s5  ;;  %v4794_v20 = vsel %vm394_vm1, 0.0, %v2063_v44 }
 0x279   : > { %v1592_v17 = vpop.permute.xlu0 %1591  ;;  %v1695_v39 = vsel %vm1679_vm10, %v1678_v21, %v1437_v48  ;;  %v1988_v21 = vmul.f32 %v4663_v6, %v4663_v6  ;;  %vm2733_vm10 = vcmask 916480  }
 0x27a   : > { %v1745_v53 = vsel %vm1730_vm13, %v1728_v16, %v1592_v17 }
 0x27b   : > { %3052 = vmatprep.mubr.msk.f32.mxu1 %vm1752_vm14, %v1745_v53 }
 0x27c   : > { %v1487_v12 = vpop.permute.xlu1 %1486  ;;  %2700 = vrot.lane.b32.xlu1 %v2588_v5, %s5346_s18 }
 0x27d   : > { %v1712_v11 = vsel %vm1696_vm11, %v1695_v39, %v1487_v12 }
 0x280   : > { %v1541_v25 = vpop.permute.xlu1 %1540 }
 0x281   : > { %v1729_v41 = vsel %vm1713_vm12, %v1712_v11, %v1541_v25 }
 0x284   : > { %v1594_v43 = vpop.permute.xlu1 %1593 }
 0x285   : > { %v1746_v52 = vsel %vm1730_vm13, %v1729_v41, %v1594_v43  ;;  %v2003_v41 = vsel %vm1628_vm7, %v1987_v46, 0.0 }
 0x286   : > { %3053 = vmatmul.mubr.msk.f32.gmra.mxu1 %vm1752_vm14, %v1746_v52  ;;  %v2064_v52 = vrot.slane %v4663_v6, 7 }
 0x288   : > { %v2119_v10 = vsel %vm394_vm1, %v2064_v52, 0.0 }
 0x2ae   : > { %v4688_v60 = vpop.f32.mrf.mxu0 }
 0x2af   : > { %v1955_v33 = vsel %vm1628_vm7, %v4688_v60, 0.0  ;;  %v1990_v58 = vmul.f32 %v4688_v60, %v4688_v60 }
 0x2b0   : > { %v4690_v47 = vpop.f32.mrf.mxu0 }
 0x2b1   : > { %v1953_v0 = vsel %vm1628_vm7, %v4690_v47, 0.0  ;;  %v1989_v39 = vmul.f32 %v4690_v47, %v4690_v47  ;;  %v2066_v29 = vrot.slane %v4690_v47, 7 }
 0x2b2   : > { %v1954_v32 = vadd.f32 %v1953_v0, %v1952_v63  ;;  %v2004_v0 = vsel %vm1628_vm7, %v1988_v21, 0.0 }
 0x2b4   : > { %v1956_v37 = vadd.f32 %v1955_v33, %v1954_v32  ;;  %v2067_v32 = vrot.slane %v4688_v60, 7  ;;  %v2006_v33 = vsel %vm1628_vm7, %v1989_v39, 0.0 }
 0x2b6   : > { %v4787_v51 = vsel %vm394_vm1, %v2067_v32, 0.0 }
 0x2e3   : > { %v4721_v54 = vpop.f32.mrf.mxu1 }
 0x2e4   : > { %v1967_v49 = vsel %vm1628_vm7, %v4721_v54, 0.0  ;;  %v5320_v22 = vrot.slane %v4721_v54, 7 }
 0x2e5   : > { %v4727_v38 = vpop.f32.mrf.mxu1 }
 0x2e6   : > { %v1965_v19 = vsel %vm1628_vm7, %v4727_v38, 0.0  ;;  %v5319_v31 = vrot.slane %v4727_v38, 7 }
 0x2ea   : > { %v4711_v23 = vpop.f32.mrf.mxu0 }
 0x2eb   : > { %v1959_v30 = vsel %vm1628_vm7, %v4711_v23, 0.0  ;;  %v2070_v11 = vrot.slane %v4711_v23, 7 }
 0x2ec   : > { %v4713_v7 = vpop.f32.mrf.mxu0 }
 0x2ed   : > { %v1957_v34 = vsel %vm1628_vm7, %v4713_v7, 0.0  ;;  %v4768_v1 = vsel %vm394_vm1, %v2070_v11, 0.0  ;;  %v2069_v36 = vrot.slane %v4713_v7, 7 }
 0x2ee   : > { %v1958_v40 = vadd.f32 %v1957_v34, %v1956_v37  ;;  %v2005_v37 = vadd.f32 %v2004_v0, %v2003_v41  ;;  %v2399_v24 = vcombine.low %v2119_v10, %v4768_v1  ;;  %v2008_v34 = vsel %vm1628_vm7, %v1990_v58, 0.0 }
 0x2f0   : > { %v1960_v14 = vadd.f32 %v1959_v30, %v1958_v40  ;;  %v2007_v9 = vadd.f32 %v2006_v33, %v2005_v37 }
 0x30f   : > { %v4719_v27 = vpop.f32.mrf.mxu0 }
 0x310   : > { %v1963_v57 = vsel %vm1628_vm7, %v4719_v27, 0.0  ;;  %v5317_v43 = vrot.slane %v4719_v27, 7 }
 0x311   : > { %v4723_v8 = vpop.f32.mrf.mxu0 }
 0x312   : > { %v1961_v2 = vsel %vm1628_vm7, %v4723_v8, 0.0  ;;  %v4775_v3 = vsel %vm394_vm1, %v5317_v43, 0.0  ;;  %v5316_v50 = vrot.slane %v4723_v8, 7 }
 0x313   : > { %v1962_v61 = vadd.f32 %v1961_v2, %v1960_v14  ;;  %v2415_v5 = vcombine.low %v4787_v51, %v4775_v3  ;;  %v4812_v2 = vsel %vm394_vm1, 0.0, %v2066_v29 }
 0x314   : > { %v4803_v40 = vsel %vm394_vm1, 0.0, %v5316_v50 }
 0x315   : > { %v1964_v13 = vadd.f32 %v1963_v57, %v1962_v61  ;;  %v2123_v61 = vsel %vm394_vm1, %v5320_v22, 0.0  ;;  %v2009_v57 = vadd.f32 %v2008_v34, %v2007_v9  ;;  %v1991_v9 = vmul.f32 %v4713_v7, %v4713_v7 }
 0x316   : > { %v5400_v7 = vrot.slane %v4727_v38, 7 }
 0x317   : > { %v1966_v59 = vadd.f32 %v1965_v19, %v1964_v13 }
 0x319   : > { %v1968_v42 = vadd.f32 %v1967_v49, %v1966_v59  ;;  %v4823_v59 = vsel %vm394_vm1, 0.0, %v5319_v31  ;;  %v1992_v49 = vmul.f32 %v4711_v23, %v4711_v23  ;;  %v5399_v23 = vrot.slane %v4721_v54, 7 }
 0x31a   : > { %v4735_v62 = vpop.f32.mrf.mxu1 }
 0x31b   : > { %v1971_v48 = vsel %vm1628_vm7, %v4735_v62, 0.0  ;;  %v5315_v30 = vrot.slane %v4735_v62, 7  ;;  %v2012_v58 = vsel %vm1628_vm7, %v1992_v49, 0.0 }
 0x31c   : > { %v4737_v28 = vpop.f32.mrf.mxu1 }
 0x31d   : > { %v1969_v63 = vsel %vm1628_vm7, %v4737_v28, 0.0  ;;  %v2124_v46 = vsel %vm394_vm1, %v5315_v30, 0.0 }
 0x31e   : > { %v1970_v15 = vadd.f32 %v1969_v63, %v1968_v42  ;;  %v2407_v42 = vrot.slane %v2399_v24, %v5385_v56 }
 0x320   : > { %v1972_v16 = vadd.f32 %v1971_v48, %v1970_v15  ;;  %v4832_v15 = vsel %vm394_vm1, 0.0, %v2069_v36  ;;  %v2423_v48 = vrot.slane %v2415_v5, %v5385_v56 }
 0x321   : > { %v2127_v24 = vcombine.low %v4794_v20, %v4832_v15 }
 0x322   : > { %v2463_v34 = vcombine.low %v2407_v42, %v2423_v48 }
 0x324   : > { %v4880_v22 = vrot.slane %v2463_v34, %v5389_v26  ;;  %v2144_v34 = vcombine.high %v4812_v2, %v4803_v40 }
 0x333   : > { %v4743_v17 = vpop.f32.mrf.mxu1 }
 0x334   : > { %v1975_v35 = vsel %vm1628_vm7, %v4743_v17, 0.0  ;;  %v5313_v45 = vrot.slane %v4743_v17, 7 }
 0x335   : > { %v4745_v53 = vpop.f32.mrf.mxu1 }
 0x336   : > { %v1973_v12 = vsel %vm1628_vm7, %v4745_v53, 0.0  ;;  %v2125_v14 = vsel %vm394_vm1, %v5313_v45, 0.0  ;;  %v5314_v13 = vrot.slane %v4745_v53, 7 }
 0x337   : > { %v1974_v18 = vadd.f32 %v1973_v12, %v1972_v16  ;;  %v2143_v16 = vcombine.low %v4812_v2, %v4803_v40  ;;  %v2431_v12 = vcombine.low %v2123_v61, %v2125_v14  ;;  %v2432_v31 = vcombine.high %v2123_v61, %v2125_v14 }
 0x338   : > { %v4851_v41 = vsel %vm394_vm1, 0.0, %v5314_v13  ;;  %v2128_v40 = vcombine.high %v4794_v20, %v4832_v15 }
 0x339   : > { %v1976_v25 = vadd.f32 %v1975_v35, %v1974_v18  ;;  %v2078_v35 = vrot.slane %v4737_v28, 7  ;;  %v2439_v45 = vrot.slane %v2431_v12, %v5385_v56  ;;  %v2151_v49 = vrot.slane %v2143_v16, %v5385_v56 }
 0x33b   : > { %v2116_v43 = vsel %vm394_vm1, 0.0, %v2078_v35 }
 0x346   : > { %v4818_v19 = vpop.f32.mrf.mxu1 }
 0x347   : > { %v5318_v63 = vrot.slane %v4818_v19, 7  ;;  %v1979_v5 = vsel %vm1628_vm7, %v4818_v19, 0.0 }
 0x348   : > { %v4837_v18 = vpop.f32.mrf.mxu1 }
 0x349   : > { %v2126_v21 = vsel %vm394_vm1, %v5318_v63, 0.0  ;;  %v1977_v39 = vsel %vm1628_vm7, %v4837_v18, 0.0  ;;  %v5321_v37 = vrot.slane %v4837_v18, 7 }
 0x34a   : > { %v2447_v0 = vcombine.low %v2124_v46, %v2126_v21  ;;  %v1978_v33 = vadd.f32 %v1977_v39, %v1976_v25  ;;  %v2400_v25 = vcombine.high %v2119_v10, %v4768_v1  ;;  %v2159_v39 = vcombine.low %v4823_v59, %v4851_v41 }
 0x34b   : > { %v2118_v50 = vsel %vm394_vm1, 0.0, %v5321_v37  ;;  %v2448_v12 = vcombine.high %v2124_v46, %v2126_v21  ;;  %v2135_v1 = vrot.slane %v2127_v24, %v5385_v56  ;;  %v2416_v10 = vcombine.high %v4787_v51, %v4775_v3 }
 0x34c   : > { %v2455_v13 = vrot.slane %v2447_v0, %v5385_v56  ;;  %v4863_v30 = vadd.f32 %v1979_v5, %v1978_v33  ;;  %v2010_v33 = vsel %vm1628_vm7, %v1991_v9, 0.0  ;;  %v2175_v16 = vcombine.low %v2116_v43, %v2118_v50 }
 0x34d   : > { %v2464_v5 = vcombine.high %v2407_v42, %v2423_v48  ;;  %v4886_v46 = vrot.slane %v2400_v25, %v5385_v56  ;;  %v1993_v3 = vmul.f32 %v4723_v8, %v4723_v8  ;;  %v4893_v51 = vrot.slane %v2448_v12, %v5385_v56 }
 0x34e   : > { %v2495_v63 = vcombine.low %v2439_v45, %v2455_v13  ;;  %v2496_v0 = vcombine.high %v2439_v45, %v2455_v13  ;;  %v2191_v45 = vcombine.low %v2135_v1, %v2151_v49  ;;  %v2167_v13 = vrot.slane %v2159_v39, %v5385_v56 }
 0x34f   : > { %v2183_v21 = vrot.slane %v2175_v16, %v5385_v56  ;;  %v2011_v42 = vadd.f32 %v2010_v33, %v2009_v57  ;;  %v4899_v24 = vrot.slane %v2416_v10, %v5385_v56  ;;  %v4904_v25 = vrot.slane %v2432_v31, %v5385_v56 }
 0x350   : > { %v4883_v37 = vrot.slane %v2495_v63, %v5389_v26  ;;  %v2510_v61 = vrot.slane %v2496_v0, %v5389_v26  ;;  %v2176_v63 = vcombine.high %v2116_v43, %v2118_v50  ;;  %v2478_v39 = vrot.slane %v2464_v5, %v5389_v26 }
 0x351   : > { %v2223_v48 = vcombine.low %v2167_v13, %v2183_v21  ;;  %v2224_v9 = vcombine.high %v2167_v13, %v2183_v21  ;;  %v2192_v12 = vcombine.high %v2135_v1, %v2151_v49  ;;  %v2160_v57 = vcombine.high %v4823_v59, %v4851_v41 }
 0x352   : > { %v2528_v14 = vcombine.high %v4880_v22, %v4883_v37  ;;  %v4911_v43 = vrot.slane %v2191_v45, %v5389_v26  ;;  %v2014_v31 = vsel %vm1628_vm7, %v1993_v3, 0.0  ;;  %v2511_v2 = vcombine.low %v4904_v25, %v4893_v51 }
 0x353   : > { %v4914_v50 = vrot.slane %v2223_v48, %v5389_v26  ;;  %v2529_v0 = vcombine.low %v2478_v39, %v2510_v61  ;;  %v2013_v33 = vadd.f32 %v2012_v58, %v2011_v42  ;;  %v4922_v49 = vrot.slane %v2176_v63, %v5385_v56 }
 0x354   : > { %2652 = vrot.lane.b32.xlu1 %v2528_v14, %s5365_s21  ;;  %v2238_v41 = vrot.slane %v2224_v9, %v5389_v26  ;;  %v1994_v1 = vmul.f32 %v4719_v27, %v4719_v27  ;;  %v2479_v20 = vcombine.low %v4886_v46, %v4899_v24  ;;  %v4933_v10 = vrot.slane %v2144_v34, %v5385_v56 }
 0x355   : > { %v2256_v59 = vcombine.high %v4911_v43, %v4914_v50  ;;  %v2015_v15 = vadd.f32 %v2014_v31, %v2013_v33  ;;  %v4936_v58 = vrot.slane %v2160_v57, %v5385_v56  ;;  %v2206_v16 = vrot.slane %v2192_v12, %v5389_v26 }
 0x356   : > { %v1996_v5 = vmul.f32 %v4721_v54, %v4721_v54  ;;  %v1995_v45 = vmul.f32 %v4727_v38, %v4727_v38  ;;  %v2530_v13 = vcombine.high %v2478_v39, %v2510_v61  ;;  %v2519_v21 = vrot.slane %v2511_v2, %v5389_v26 }
 0x357   : > { %2592 = vrot.lane.b32.xlu0 %v2256_v59, %s5365_s21  ;;  %v4950_v3 = vsel %vm394_vm1, %v2063_v44, %v2064_v52  ;;  %v4953_v14 = vrot.slane %v2128_v40, %v5385_v56  ;;  %v2239_v42 = vcombine.low %v4936_v58, %v4922_v49  ;;  %v2257_v63 = vcombine.low %v2206_v16, %v2238_v41 }
 0x358   : > { %2656 = vrot.lane.b32.xlu1 %v2529_v0, %s5367_s3  ;;  %v2016_v48 = vsel %vm1628_vm7, %v1994_v1, 0.0  ;;  %v2487_v61 = vrot.slane %v2479_v20, %v5389_v26  ;;  %v2527_v6 = vcombine.low %v4880_v22, %v4883_v37  ;;  %v2255_v4 = vcombine.low %v4911_v43, %v4914_v50 }
 0x359   : > { %v2068_v52 = vsel %vm394_vm1, %v2066_v29, %v2067_v32  ;;  %v2071_v44 = vsel %vm394_vm1, %v2069_v36, %v2070_v11  ;;  %v2017_v9 = vadd.f32 %v2016_v48, %v2015_v15  ;;  %v2207_v34 = vcombine.low %v4953_v14, %v4933_v10 }
 0x35a   : > { %v2020_v39 = vsel %vm1628_vm7, %v1996_v5, 0.0  ;;  %v2018_v60 = vsel %vm1628_vm7, %v1995_v45, 0.0  ;;  %v2512_v47 = vcombine.high %v4904_v25, %v4893_v51  ;;  %v2531_v32 = vcombine.low %v2487_v61, %v2519_v21 }
 0x35b   : > { %2596 = vrot.lane.b32.xlu0 %v2257_v63, %s5367_s3  ;;  %v2077_v11 = vsel %vm394_vm1, %v5400_v7, %v5399_v23  ;;  %v5401_v29 = vrot.slane %v4818_v19, 7  ;;  %v5402_v36 = vrot.slane %v4837_v18, 7  ;;  %v2258_v57 = vcombine.high %v2206_v16, %v2238_v41 }
 0x35c   : > { %2660 = vrot.lane.b32.xlu1 %v2530_v13, %s5372_s12  ;;  %v2247_v40 = vrot.slane %v2239_v42, %v5389_v26  ;;  %v2263_v31 = vcombine.low %v4950_v3, %v2071_v44  ;;  %v2480_v51 = vcombine.high %v4886_v46, %v4899_v24  ;;  %v5403_v54 = vrot.slane %v4719_v27, 7 }
 0x35d   : > { %v2086_v12 = vsel %vm394_vm1, %v5402_v36, %v5401_v29  ;;  %v5404_v38 = vrot.slane %v4723_v8, 7  ;;  %v1997_v2 = vmul.f32 %v4737_v28, %v4737_v28  ;;  %v2019_v0 = vadd.f32 %v2018_v60, %v2017_v9 }
 0x35e   : > { %v5405_v33 = vrot.slane %v4735_v62, 7  ;;  %v5406_v46 = vrot.slane %v4743_v17, 7  ;;  %v5407_v27 = vrot.slane %v4745_v53, 7  ;;  %v2215_v24 = vrot.slane %v2207_v34, %v5389_v26 }
 0x35f   : > { %v2074_v25 = vsel %vm394_vm1, %v5404_v38, %v5403_v54  ;;  %2600 = vrot.lane.b32.xlu0 %v2258_v57, %s5372_s12  ;;  %v2264_v41 = vcombine.high %v4950_v3, %v2071_v44  ;;  %v2532_v20 = vcombine.high %v2487_v61, %v2519_v21  ;;  %v2526_v15 = vrot.slane %v2512_v47, %v5389_v26  ;;  %s5412_s12 = sld [smem:[#allocation37_spill]] }
 0x360   : > { %2664 = vrot.lane.b32.xlu1 %v2531_v32, %s5374_s8  ;;  %v2080_v59 = vsel %vm394_vm1, %v2078_v35, %v5405_v33  ;;  %v2083_v8 = vsel %vm394_vm1, %v5407_v27, %v5406_v46  ;;  %v2240_v28 = vcombine.high %v4936_v58, %v4922_v49  ;;  %v2259_v16 = vcombine.low %v2215_v24, %v2247_v40 }
 0x361   : > { %v2312_v1 = vcombine.high %v2080_v59, %v2086_v12  ;;  %v2311_v35 = vcombine.low %v2080_v59, %v2086_v12  ;;  %v2568_v5 = vcombine.high %v4704_v55, %v4704_v55  ;;  %v2280_v45 = vcombine.high %v2068_v52, %v2074_v25 }
 0x362   : > { %v2022_v13 = vsel %vm1628_vm7, %v1997_v2, 0.0  ;;  %v2296_v42 = vcombine.high %v2077_v11, %v2083_v8  ;;  %v2494_v3 = vrot.slane %v2480_v51, %v5389_v26  ;;  %v2208_v21 = vcombine.high %v4953_v14, %v4933_v10 }
 0x363   : > { %v2279_v63 = vcombine.low %v2068_v52, %v2074_v25  ;;  %v2021_v48 = vadd.f32 %v2020_v39, %v2019_v0  ;;  %v2295_v61 = vcombine.low %v2077_v11, %v2083_v8  ;;  %2604 = vrot.lane.b32.xlu0 %v2259_v16, %s5374_s8  ;;  %v1998_v49 = vmul.f32 %v4735_v62, %v4735_v62 }
 0x364   : > { %2668 = vrot.lane.b32.xlu1 %v2532_v20, %s5355_s14  ;;  %v1999_v55 = vmul.f32 %v4745_v53, %v4745_v53  ;;  %v5032_v58 = vrot.slane %v2312_v1, %v5385_v56  ;;  %v2533_v44 = vcombine.low %v2494_v3, %v2526_v15  ;;  %v2319_v34 = vrot.slane %v2311_v35, %v5385_v56 }
 0x365   : > { %v2023_v9 = vadd.f32 %v2022_v13, %v2021_v48  ;;  %v2260_v60 = vcombine.high %v2215_v24, %v2247_v40  ;;  %v2254_v10 = vrot.slane %v2240_v28, %v5389_v26  ;;  %v2294_v14 = vrot.slane %v2280_v45, %v5385_v56 }
 0x366   : > { %v2310_v52 = vrot.slane %v2296_v42, %v5385_v56  ;;  %v5040_v62 = vrot.slane %v2568_v5, %v5389_v26  ;;  %v2278_v53 = vrot.slane %v2264_v41, %v5385_v56  ;;  %v2287_v39 = vrot.slane %v2279_v63, %v5385_v56 }
 0x367   : > { %v2303_v47 = vrot.slane %v2295_v61, %v5385_v56  ;;  %2608 = vrot.lane.b32.xlu0 %v2260_v60, %s5355_s14  ;;  %v2222_v32 = vrot.slane %v2208_v21, %v5389_v26  ;;  %v2024_v23 = vsel %vm1628_vm7, %v1998_v49, 0.0  ;;  %v2026_v7 = vsel %vm1628_vm7, %v1999_v55, 0.0  ;;  %s357_s14 = scalar_lea.vmem [#allocation8], %s3665_s6 }
 0x368   : > { %2672 = vrot.lane.b32.xlu1 %v2533_v44, %s5354_s10  ;;  %v2376_v11 = vcombine.high %v2310_v52, %v5032_v58  ;;  %v2534_v29 = vcombine.high %v2494_v3, %v2526_v15  ;;  %v2271_v36 = vrot.slane %v2263_v31, %v5385_v56  ;;  %v2025_v12 = vadd.f32 %v2024_v23, %v2023_v9  ;;  %s2790_s11 = sshll.u32 %s357_s14, 4  ;;  %s5142_s11 = int_to_ptr.vmem [resolvable:$true] %s2790_s11 }
 0x369   : > { %v2359_v57 = vcombine.low %v2303_v47, %v2319_v34  ;;  %v2261_v40 = vcombine.low %v2222_v32, %v2254_v10  ;;  %v2344_v51 = vcombine.high %v2278_v53, %v2294_v14  ;;  %v2000_v54 = vmul.f32 %v4743_v17, %v4743_v17 }
 0x36a   : > { %v2001_v38 = vmul.f32 %v4837_v18, %v4837_v18  ;;  %v2589_v25 = vcombine.low %v5040_v62, %v5040_v62  ;;  %v2327_v2 = vcombine.low %v2271_v36, %v2287_v39  ;;  %v2027_v0 = vadd.f32 %v2026_v7, %v2025_v12 }
 0x36b   : > { %2612 = vrot.lane.b32.xlu0 %v2261_v40, %s5354_s10  ;;  %v2390_v56 = vrot.slane %v2376_v11, %v5389_v26  ;;  %v2262_v31 = vcombine.high %v2222_v32, %v2254_v10  ;;  %v2367_v33 = vrot.slane %v2359_v57, %v5389_v26  ;;  %v2028_v59 = vsel %vm1628_vm7, %v2000_v54, 0.0  ;;  %s5410_s10 = smov 120  }
 0x36c   : > { %2676 = vrot.lane.b32.xlu1 %v2534_v29, %s5408_s0  ;;  %v2030_v17 = vsel %vm1628_vm7, %v2001_v38, 0.0  ;;  %v2358_v18 = vrot.slane %v2344_v51, %v5389_v26  ;;  %v2029_v46 = vadd.f32 %v2028_v59, %v2027_v0  ;;  %v2335_v27 = vrot.slane %v2327_v2, %v5389_v26 }
 0x36d   : > { %v2002_v8 = vmul.f32 %v4818_v19, %v4818_v19  ;;  %v2360_v1 = vcombine.high %v2303_v47, %v2319_v34  ;;  %v2328_v15 = vcombine.high %v2271_v36, %v2287_v39  ;;  %v2375_v13 = vcombine.low %v2310_v52, %v5032_v58 }
 0x36e   : > { %v2398_v24 = vcombine.high %v2358_v18, %v2390_v56  ;;  %v2031_v41 = vadd.f32 %v2030_v17, %v2029_v46  ;;  %v2391_v20 = vcombine.low %v2335_v27, %v2367_v33  ;;  %v2392_v16 = vcombine.high %v2335_v27, %v2367_v33 }
 0x36f   : > { %2616 = vrot.lane.b32.xlu0 %v2262_v31, %s5408_s0  ;;  %v2032_v28 = vsel %vm1628_vm7, %v2002_v8, 0.0  ;;  %v2374_v5 = vrot.slane %v2360_v1, %v5389_v26  ;;  %v2342_v45 = vrot.slane %v2328_v15, %v5389_v26  ;;  %v2343_v3 = vcombine.low %v2278_v53, %v2294_v14 }
 0x370   : > { %2704 = vrot.lane.b32.xlu1 %v2589_v25, %s5409_s1  ;;  %v2033_v35 = vadd.f32 %v2032_v28, %v2031_v41  ;;  %v2383_v48 = vrot.slane %v2375_v13, %v5389_v26  ;;  %v2397_v58 = vcombine.low %v2358_v18, %v2390_v56  ;;  %v2590_v10 = vcombine.high %v5040_v62, %v5040_v62 }
 0x371   : > { %v2393_v42 = vcombine.low %v2342_v45, %v2374_v5  ;;  %v2394_v63 = vcombine.high %v2342_v45, %v2374_v5  ;;  %v2351_v61 = vrot.slane %v2343_v3, %v5389_v26  ;;  %v2681_v26 = vpop.permute.xlu1 %2680  ;;  %v1981_v56 = vrot.slane %v4863_v30, 4 }
 0x372   : > { %v2034_v19 = vrot.slane %v2033_v35, 4  ;;  %vm2719_vm1 = vcmask 457728  }
 0x373   : > { %2620 = vrot.lane.b32.xlu0 %v2391_v20, %s5353_s9  ;;  %v2395_v55 = vcombine.low %v2351_v61, %v2383_v48  ;;  %v2396_v44 = vcombine.high %v2351_v61, %v2383_v48  ;;  %v1982_v27 = vadd.f32 %v1981_v56, %v4863_v30 }
 0x374   : > { %2648 = vrot.lane.b32.xlu1 %v2398_v24, %s5410_s10  ;;  %v2035_v21 = vadd.f32 %v2034_v19, %v2033_v35 }
 0x375   : > { %v2685_v14 = vpop.permute.xlu1 %2684  ;;  %v1983_v41 = vrot.slane %v1982_v27, 2 }
 0x376   : > { %v2036_v49 = vrot.slane %v2035_v21, 2 }
 0x377   : > { %2624 = vrot.lane.b32.xlu0 %v2392_v16, %s5352_s15  ;;  %v1984_v35 = vadd.f32 %v1983_v41, %v1982_v27  ;;  %s2992_s15 = sshll.u32 %s3412_s25, 2 }
 0x378   : > { %v2037_v9 = vadd.f32 %v2036_v49, %v2035_v21 }
 0x379   : > { %v2689_v52 = vpop.permute.xlu1 %2688  ;;  %v1985_v21 = vrot.slane %v1984_v35, 1 }
 0x37a   : > { %v2038_v34 = vrot.slane %v2037_v9, 1 }
 0x37b   : > { %2628 = vrot.lane.b32.xlu0 %v2393_v42, %s5351_s7  ;;  %s2994_s7 = sshll.u32 %s3412_s25, 1 }
 0x37c   : > { %v2039_v60 = vadd.f32 %v2038_v34, %v2037_v9  ;;  %v1986_v34 = vadd.f32 %v1985_v21, %v1984_v35 }
 0x37d   : > { %v5087_v53 = vpop.permute.xlu1 %2692 }
 0x37f   : > { %2632 = vrot.lane.b32.xlu0 %v2394_v63, %s5349_s13  ;;  %s2991_s13 = sshll.u32 %s3408_s24, 1 }
 0x381   : > { %v5089_v39 = vpop.permute.xlu1 %2696 }
 0x383   : > { %2636 = vrot.lane.b32.xlu0 %v2395_v55, %s5348_s5  ;;  %s2786_s5 = sadd.s32 %s3408_s24, %s2994_s7  ;;  %s5411_s24 = sld [smem:[#allocation17_spill]] }
 0x384   : > { %s2995_s9 = sshll.u32 %s2786_s5, 4  ;;  %s3267_s7 = scalar_lea.vmem %s5142_s11, 16 }
 0x385   : > { %v5091_v47 = vpop.permute.xlu1 %2700  ;;  %s5140_s17 = scalar_lea.hbm %s5412_s12, %s2995_s9  ;;  %p3268_p12 = scmp.ne.s32.totalorder %s5142_s11, %s3267_s7 }
 0x387   : > { %2640 = vrot.lane.b32.xlu0 %v2396_v44, %s5346_s18  ;;  %s2964_s18 = sshll.u32 %s3665_s6, 4 }
 0x388   : > { %s5134_s25 = scalar_lea.vmem [#allocation7], %s2964_s18  ;;  %s3462_s18 = smov [#allocation8]  }
 0x389   : > { %p5413_p13 = scmp.ne.s32.totalorder %s5411_s24, 0  ;;  %s3271_s5 = sshll.u32 %s3462_s18, 4  ;;  %s3272_s5 = int_to_ptr.vmem [resolvable:$false] %s3271_s5 }
 0x38a   : > { %p3274_p11 = scmp.lt.s32.totalorder %s5142_s11, %s3272_s5 }
 0x38b   : > { %2644 = vrot.lane.b32.xlu0 %v2397_v58, %s5409_s1  ;;  %s2775_s1 = sshll.u32 %s5134_s25, 4  ;;  %p3269_p5 = pnand %p3268_p12, %p5413_p13  ;;  %s2776_s1 = int_to_ptr.vmem [resolvable:$true] %s2775_s1 }
 0x38d   : > { %p3270_p10 = pneg %p3269_p5 }
 0x38f   : > { %2041 = vrot.lane.b32.xlu0 %v2039_v60, %s5365_s21  ;;  %s5132_s21 = sadd.s32 %s2992_s15, %s2991_s13  ;;  %s3273_s13 = scalar_lea.vmem %s3272_s5, 32 }
 0x390   : > { %s2993_s0 = sshll.u32 %s5132_s21, 7  ;;  %p3275_p0 = scmp.lt.s32.totalorder %s3273_s13, %s3267_s7 }
 0x392   : > { %p3276_p6 = por %p3275_p0, %p3274_p11 }
 0x393   : > { %2708 = vrot.lane.b32.xlu0 %v2590_v10, %s5410_s10  ;;  %s2760_s10 = scalar_lea.sflag [#allocation9], %s3665_s6 }
 0x394   : > { %p3277_p4 = pnand %p3276_p6, %p3270_p10 }
 0x3c6   : > { %v2653_v32 = vpop.permute.xlu1 %2652 }
 0x3c7   : > { %v2737_v0 = vsel %vm1628_vm7, %v2527_v6, %v2653_v32 }
 0x3c9   : > { %v2593_v23 = vpop.permute.xlu0 %2592 }
 0x3ca   : > { %v2657_v11 = vpop.permute.xlu1 %2656  ;;  %v2711_v6 = vsel %vm1628_vm7, %v2255_v4, %v2593_v23 }
 0x3cb   : > { %v2738_v31 = vsel %vm1662_vm9, %v2737_v0, %v2657_v11 }
 0x3cd   : > { %v2597_v7 = vpop.permute.xlu0 %2596 }
 0x3ce   : > { %v2661_v36 = vpop.permute.xlu1 %2660  ;;  %v2712_v24 = vsel %vm1662_vm9, %v2711_v6, %v2597_v7  ;;  %vm2735_vm9 = vcmask 982016  }
 0x3cf   : > { %v2739_v33 = vsel %vm1696_vm11, %v2738_v31, %v2661_v36 }
 0x3d1   : > { %v2601_v29 = vpop.permute.xlu0 %2600 }
 0x3d2   : > { %v2665_v62 = vpop.permute.xlu1 %2664  ;;  %v2713_v1 = vsel %vm1696_vm11, %v2712_v24, %v2601_v29  ;;  %vm2045_vm11 = vcmask 122880  }
 0x3d3   : > { %v2740_v59 = vsel %vm1730_vm13, %v2739_v33, %v2665_v62 }
 0x3d5   : > { %v2605_v12 = vpop.permute.xlu0 %2604 }
 0x3d6   : > { %v2669_v51 = vpop.permute.xlu1 %2668  ;;  %v2714_v20 = vsel %vm1730_vm13, %v2713_v1, %v2605_v12 }
 0x3d7   : > { %v2741_v46 = vsel %vm2715_vm15, %v2740_v59, %v2669_v51 }
 0x3d9   : > { %v2609_v57 = vpop.permute.xlu0 %2608 }
 0x3da   : > { %v2673_v25 = vpop.permute.xlu1 %2672  ;;  %v2716_v15 = vsel %vm2715_vm15, %v2714_v20, %v2609_v57 }
 0x3db   : > { %v2742_v22 = vsel %vm2717_vm0, %v2741_v46, %v2673_v25 }
 0x3dd   : > { %v2613_v40 = vpop.permute.xlu0 %2612 }
 0x3de   : > { %v2677_v17 = vpop.permute.xlu1 %2676  ;;  %v2718_v43 = vsel %vm2717_vm0, %v2716_v15, %v2613_v40 }
 0x3df   : > { %v2743_v37 = vsel %vm2719_vm1, %v2742_v22, %v2677_v17 }
 0x3e0   : > { %v2744_v30 = vsel %vm2721_vm2, %v2743_v37, %v2681_v26 }
 0x3e1   : > { %v2617_v54 = vpop.permute.xlu0 %2616  ;;  %v2745_v50 = vsel %vm2723_vm3, %v2744_v30, %v2685_v14 }
 0x3e2   : > { %v2720_v4 = vsel %vm2719_vm1, %v2718_v43, %v2617_v54  ;;  %v5116_v16 = vpop.permute.xlu1 %2704  ;;  %v2746_v45 = vsel %vm2725_vm4, %v2745_v50, %v2689_v52 }
 0x3e3   : > { %v2747_v63 = vsel %vm2727_vm5, %v2746_v45, %v5087_v53 }
 0x3e4   : > { %v2748_v9 = vsel %vm2729_vm6, %v2747_v63, %v5089_v39 }
 0x3e5   : > { %v2621_v38 = vpop.permute.xlu0 %2620  ;;  %v2749_v10 = vsel %vm2731_vm8, %v2748_v9, %v5091_v47 }
 0x3e6   : > { %v2722_v5 = vsel %vm2721_vm2, %v2720_v4, %v2621_v38  ;;  %v2649_v55 = vpop.permute.xlu1 %2648 }
 0x3e9   : > { %v2625_v2 = vpop.permute.xlu0 %2624 }
 0x3ea   : > { %v2724_v19 = vsel %vm2723_vm3, %v2722_v5, %v2625_v2 }
 0x3ed   : > { %v2629_v18 = vpop.permute.xlu0 %2628 }
 0x3ee   : > { %v2726_v42 = vsel %vm2725_vm4, %v2724_v19, %v2629_v18 }
 0x3f1   : > { %v2633_v8 = vpop.permute.xlu0 %2632 }
 0x3f2   : > { %v2728_v3 = vsel %vm2727_vm5, %v2726_v42, %v2633_v8 }
 0x3f5   : > { %v2637_v28 = vpop.permute.xlu0 %2636 }
 0x3f6   : > { %v2730_v48 = vsel %vm2729_vm6, %v2728_v3, %v2637_v28 }
 0x3f9   : > { %v2641_v13 = vpop.permute.xlu0 %2640 }
 0x3fa   : > { %v2732_v61 = vsel %vm2731_vm8, %v2730_v48, %v2641_v13 }
 0x3fd   : > { %v2645_v49 = vpop.permute.xlu0 %2644 }
 0x3fe   : > { %v2734_v44 = vsel %vm2733_vm10, %v2732_v61, %v2645_v49 }
 0x3ff   : > { %v2736_v58 = vsel %vm2735_vm9, %v2734_v44, %v2649_v55 }
 0x400   : > { %2752 = vst [vmem:[%s5134_s25] sm:$0xff] %v2736_v58 }
 0x401   : > { %v2042_v60 = vpop.permute.xlu0 %2041 }
 0x402   : > { %v2044_v26 = vsel %vm1628_vm7, %v1986_v34, %v2042_v60 }
 0x403   : > { %2046 = vst.msk [vmem:[%s357_s14] sm:$0x1] %vm2045_vm11, %v2044_v26 }
 0x404   : > { %3280 = shalt.err (!%p3277_p4)
}
 0x405   : > { %s3281_s15 = scalar_lea.hbm %s5140_s17, 16  ;;  %s3285_s8 = scalar_lea.hbm %s5412_s12, 64 }
 0x406   : > { %p3282_p8 = scmp.ne.s32.totalorder %s5140_s17, %s3281_s15  ;;  %p3286_p7 = scmp.lt.s32.totalorder %s5140_s17, %s5412_s12 }
 0x407   : > { %p3287_p1 = scmp.lt.s32.totalorder %s3285_s8, %s3281_s15 }
 0x408   : > { %p3283_p9 = pnand %p3282_p8, %p5413_p13 }
 0x409   : > { %p3288_p3 = por %p3287_p1, %p3286_p7 }
 0x40a   : > { %p3284_p2 = pneg %p3283_p9 }
 0x40c   : > { %p3289_p12 = pnand %p3288_p3, %p3284_p2 }
 0x40e   : > { %3292 = shalt.err (!%p3289_p12)
}
 0x40f   : > { %3070 = dma.vmem_to_hbm [thread:$0]  (%p5413_p13), %s5142_s11, 16, %s5140_s17, %s2760_s10   ;;  %v2750_v14 = vsel %vm2733_vm10, %v2749_v10, %v5116_v16  ;;  %v2709_v52 = vpop.permute.xlu0 %2708 }
 0x410   : > { %s5414_s13 = sld [smem:[#allocation36_spill]]  ;;  %v2751_v53 = vsel %vm2735_vm9, %v2750_v14, %v2709_v52  ;;  %s2755_s9 = scalar_lea.sflag [#allocation4], %s3665_s6 }
 0x411   : > { %2753 = vst [vmem:[%s5134_s25 + $0x8] sm:$0xff] %v2751_v53  ;;  %s3293_s14 = scalar_lea.vmem %s2776_s1, 256  ;;  %s3463_s11 = smov [#allocation7]  }
 0x412   : > { %p3294_p5 = scmp.ne.s32.totalorder %s2776_s1, %s3293_s14  ;;  %s3297_s17 = sshll.u32 %s3463_s11, 4  ;;  %s3298_s17 = int_to_ptr.vmem [resolvable:$false] %s3297_s17 }
 0x413   : > { %s3299_s21 = scalar_lea.vmem %s3298_s17, 512  ;;  %p3300_p0 = scmp.lt.s32.totalorder %s2776_s1, %s3298_s17 }
 0x414   : > { %p3295_p10 = pnand %p3294_p5, %p5413_p13  ;;  %p3301_p6 = scmp.lt.s32.totalorder %s3299_s21, %s3293_s14 }
 0x416   : > { %s5177_s15 = scalar_lea.hbm %s5414_s13, %s2993_s0  ;;  %p3296_p11 = pneg %p3295_p10 }
 0x417   : > { %p3302_p4 = por %p3301_p6, %p3300_p0 }
 0x419   : > { %p3303_p8 = pnand %p3302_p4, %p3296_p11 }
 0x41b   : > { %3306 = shalt.err (!%p3303_p8)
}
 0x41c   : > { %s3307_s25 = scalar_lea.hbm %s5177_s15, 256  ;;  %s3311_s10 = scalar_lea.hbm %s5414_s13, 1024 }
 0x41d   : > { %p3308_p9 = scmp.ne.s32.totalorder %s5177_s15, %s3307_s25  ;;  %p3312_p1 = scmp.lt.s32.totalorder %s5177_s15, %s5414_s13 }
 0x41e   : > { %p3313_p3 = scmp.lt.s32.totalorder %s3311_s10, %s3307_s25 }
 0x41f   : > { %p3309_p2 = pnand %p3308_p9, %p5413_p13 }
 0x420   : > { %p3314_p12 = por %p3313_p3, %p3312_p1 }
 0x421   : > { %p3310_p7 = pneg %p3309_p2 }
 0x423   : > { %p3315_p5 = pnand %p3314_p12, %p3310_p7 }
 0x425   : > { %3318 = shalt.err (!%p3315_p5)
}
 0x426   : > { %3069 = dma.vmem_to_hbm [thread:$0]  (%p5413_p13), %s2776_s1, 256, %s5177_s15, %s2755_s9  }
 0x427 PF: > { %s5415_s18 = sld [smem:[#allocation14_spill]]  ;;  %p3088_p10 = scmp.ge.s32.totalorder %s3424_s28, 2 }
 0x428   : > { %p5416_p11 = scmp.ne.s32.totalorder %s5335_s16, 0 }
 0x42a   : > { %p3081_p0 = pnand %p3088_p10, %p5416_p11 }
 0x42c   : > { %p3082_p6 = pneg %p3081_p0 }
 0x42d   : > { %s2802_s7 = sand.u32 1, %s5415_s18  }
 0x42e   : > { %s2803_s5 = scalar_lea.sflag [#allocation4], %s2802_s7 }
 0x42f   : > { %3372 = dma.done.wait (%p3082_p6), %s2803_s5, 256  }
 0x430   : > { %3374 = vsyncadd (%p3082_p6), %s2803_s5, 4294967040  ;;  %s2812_s14 = scalar_lea.sflag [#allocation9], %s2802_s7 }
 0x431   : > { %3376 = dma.done.wait (%p3082_p6), %s2812_s14, 16  }
 0x432   : > { %3378 = vsyncadd (%p3082_p6), %s2812_s14, 4294967280  ;;  %s28_s28 = sadd.s32 1, %s3424_s28   ;;  %s5417_s16 = sld [smem:[#allocation15_spill]] }
 0x433   : > { %p25_p4 = scmp.ge.s32.totalorder %s28_s28, 6   ;;  %s5418_s1 = sld [smem:[#allocation16_spill]] }
 0x434   : > { %s5419_s18 = smov %s3388_s19  ;;  %s5420_s19 = smov %s3392_s20 }
 0x435   : > { %s5421_s20 = smov %s3643_s30  ;;  %s5422_s21 = smov %s3400_s22 }
 0x436   : > { %s5423_s22 = smov %s3404_s23  ;;  %s5424_s23 = smov %s3598_s29 }
 0x437   : > { %s5425_s24 = smov %s3416_s26  ;;  %s5426_s25 = smov %s3420_s27 }
 0x438   : > { %s5427_s26 = smov %s5417_s16  ;;  %27 = sbr.rel (!%p25_p4) target bundleno = 19 (0x13), region = 114 }
 0x439   : > { %s5428_s27 = smov %s5418_s1 }
 0x43d   :  { %2816 = vsyncpa [#allocation3], 1 }
 0x43e   :  { %2818 = vsyncpa [#allocation3 + $0x1], 1 }
 0x43f   :  { %2819 = vsyncpa [#allocation6], 1 }
 0x440   :  { %2821 = vsyncpa [#allocation6 + $0x1], 1 }
 0x441   :  { %2822 = vsyncpa [#allocation4], 1 }
 0x442   :  { %2824 = vsyncpa [#allocation4 + $0x1], 1 }
 0x443   :  { %2825 = vsyncpa [#allocation9], 1 }
 0x444   :  { %2827 = vsyncpa [#allocation9 + $0x1], 1 }

</bundles_post_ra>
